<compile_context>
chip_gen: v5e
topology: v5e:2x2
jax: 0.10.0
libtpu: 0.0.40
codegen_flags: <defaults>
</compile_context>

<pallas_src>
import math

import numpy as np

import jax
import jax.numpy as jnp
from jax.experimental import pallas as pl
from jax.experimental.pallas import tpu as pltpu

# ----------------------------- model hyper-parameters ------------------------
B = 2                     # logical batch size
ROWS = 8                  # batch padded to one full sublane tile inside the kernel
T0 = 32                   # input frames (Lmax)
D0 = 16                   # input feature dim (idim)
CONV_CHANS = (4, 8, 16)   # conv_chans_list
KSIZE = 3
STRIDE = 2
PAD = 1
GRU_UNITS = 32
BN_EPS = 1e-5
N_CONV = len(CONV_CHANS)


def _conv_out_len(n):
    return (n + 2 * PAD - KSIZE) // STRIDE + 1


T_SIZES = [T0]
D_SIZES = [D0]
for _ in range(N_CONV):
    T_SIZES.append(_conv_out_len(T_SIZES[-1]))
    D_SIZES.append(_conv_out_len(D_SIZES[-1]))
T_OUT, D_OUT = T_SIZES[-1], D_SIZES[-1]            # (4, 2)
GRU_IN = CONV_CHANS[-1] * D_OUT                    # 32  (GRU input size = C * D')
CONV_FLAT = T_OUT * GRU_IN                         # 128 (flat conv output per row)
GX_COLS = 3 * T_OUT * GRU_UNITS                    # 384 (packed x-side gate columns)
GH_COLS = 3 * GRU_UNITS                            # 96  (packed h-side gate columns)


# ------------------------------ fused Pallas kernel ---------------------------
def _ref_encoder_kernel(x_ref, m0_ref, b0_ref, b1_ref, b2_ref,
                        wh_ref, bi_ref, bh_ref,
                        m1_hbm, m2_hbm, wi_hbm,
                        o_ref,
                        m1_vmem, m2_vmem, wi_vmem, sem):
    """Whole OnnxReferenceEncoder forward; all activations stay in VMEM/vregs."""
    f32 = jnp.float32
    H = GRU_UNITS

    # --- kick off HBM->VMEM copies for later-used weights (hidden behind conv work) --
    cp_m1 = pltpu.make_async_copy(m1_hbm, m1_vmem, sem.at[0])
    cp_m2 = pltpu.make_async_copy(m2_hbm, m2_vmem, sem.at[1])
    cp_wi = pltpu.make_async_copy(wi_hbm, wi_vmem, sem.at[2])
    cp_m1.start()
    cp_m2.start()
    cp_wi.start()

    # --- conv stack: 3 x (dense-conv matmul with BN scale pre-folded -> shift -> ReLU)
    h = jnp.dot(x_ref[...], m0_ref[...], preferred_element_type=f32)      # (ROWS, 512)
    h = jnp.maximum(h + b0_ref[...], 0.0)

    cp_m1.wait()                                                          # m1 now in VMEM
    h = jnp.dot(h, m1_vmem[...], preferred_element_type=f32)              # (ROWS, 256)
    h = jnp.maximum(h + b1_ref[...], 0.0)

    cp_m2.wait()                                                          # m2 now in VMEM
    h = jnp.dot(h, m2_vmem[...], preferred_element_type=f32)              # (ROWS, 128)
    h = jnp.maximum(h + b2_ref[...], 0.0)
    # h: (ROWS, T_OUT*GRU_IN) in flat (t, c, d) order == the transpose(1,2).view
    # GRU input sequence; timestep t lives in columns [t*GRU_IN, (t+1)*GRU_IN).

    # --- GRU input-side projections for ALL gates & timesteps in one lane-dense matmul
    cp_wi.wait()                                                          # wi now in VMEM
    gx_all = jnp.dot(h, wi_vmem[...], preferred_element_type=f32) + bi_ref[...]
    # gx_all: (ROWS, 384); column block (g*T_OUT + t)*H : ... holds x_t @ W_ig^T + b_ig.

    def sigmoid(v):
        # exp -> EUP, reciprocal(approx=True) -> EUP vrcp; keeps the VPU path short.
        return pl.reciprocal(1.0 + jnp.exp(-v), approx=True)

    # --- single-layer GRU, unrolled over the static T_OUT steps ----------------
    state = jnp.zeros((ROWS, H), f32)                 # h0 = zeros (torch default)
    for t in range(T_OUT):
        # one packed hidden-side matmul per step: (ROWS, H) @ (H, 3H)
        gh = jnp.dot(state, wh_ref[...], preferred_element_type=f32) + bh_ref[...]
        gx_r = gx_all[:, (0 * T_OUT + t) * H:(0 * T_OUT + t + 1) * H]
        gx_z = gx_all[:, (1 * T_OUT + t) * H:(1 * T_OUT + t + 1) * H]
        gx_n = gx_all[:, (2 * T_OUT + t) * H:(2 * T_OUT + t + 1) * H]
        r = sigmoid(gx_r + gh[:, 0:H])
        z = sigmoid(gx_z + gh[:, H:2 * H])
        n = jnp.tanh(gx_n + r * gh[:, 2 * H:3 * H])
        state = n + z * (state - n)                   # == (1-z)*n + z*state

    o_ref[...] = state                                # ref_embs[-1]


def _vmem_spec(shape):
    nd = len(shape)
    return pl.BlockSpec(shape, lambda i, _nd=nd: (0,) * _nd)


def onnx_reference_encoder_forward(speech, ops):
    """speech: (B, T0, D0) float32; ops: preprocessed operands. Returns (B, GRU_UNITS)."""
    x_flat = jnp.zeros((ROWS, T0 * D0), jnp.float32)
    x_flat = x_flat.at[:B].set(speech.reshape(B, T0 * D0).astype(jnp.float32))

    # BlockSpec-managed (needed immediately / tiny):
    vmem_args = (x_flat, ops["m0"], ops["b0"], ops["b1"], ops["b2"],
                 ops["wh"], ops["bi"], ops["bh"])
    # Stay in HBM; copied into VMEM scratch inside the kernel, overlapped with compute:
    hbm_args = (ops["m1"], ops["m2"], ops["wi"])

    grid_spec = pltpu.PrefetchScalarGridSpec(
        num_scalar_prefetch=0,
        grid=(1,),
        in_specs=[_vmem_spec(a.shape) for a in vmem_args]
                 + [pl.BlockSpec(memory_space=pl.ANY)] * len(hbm_args),
        out_specs=pl.BlockSpec((ROWS, GRU_UNITS), lambda i: (0, 0)),
        scratch_shapes=[
            pltpu.VMEM(ops["m1"].shape, jnp.float32),
            pltpu.VMEM(ops["m2"].shape, jnp.float32),
            pltpu.VMEM(ops["wi"].shape, jnp.float32),
            pltpu.SemaphoreType.DMA((3,)),
        ],
    )
    out = pl.pallas_call(
        _ref_encoder_kernel,
        out_shape=jax.ShapeDtypeStruct((ROWS, GRU_UNITS), jnp.float32),
        grid_spec=grid_spec,
        compiler_params=pltpu.CompilerParams(dimension_semantics=("arbitrary",)),
    )(*vmem_args, *hbm_args)
    return out[:B]


# ------------------------- parameters & exact preprocessing -------------------
def init_torch_like_params(key):
    """Random parameters mirroring the PyTorch module's state_dict layout."""
    params = {}
    keys = iter(jax.random.split(key, 32))
    cin = 1
    for i, cout in enumerate(CONV_CHANS):
        params[f"conv{i}_w"] = 0.15 * jax.random.normal(
            next(keys), (cout, cin, KSIZE, KSIZE), jnp.float32)
        params[f"bn{i}_gamma"] = 1.0 + 0.1 * jax.random.normal(next(keys), (cout,), jnp.float32)
        params[f"bn{i}_beta"] = 0.1 * jax.random.normal(next(keys), (cout,), jnp.float32)
        params[f"bn{i}_mean"] = 0.1 * jax.random.normal(next(keys), (cout,), jnp.float32)
        params[f"bn{i}_var"] = 1.0 + 0.2 * jax.random.uniform(next(keys), (cout,), jnp.float32)
        cin = cout
    s = 1.0 / math.sqrt(GRU_UNITS)
    params["gru_w_ih"] = s * jax.random.normal(next(keys), (3 * GRU_UNITS, GRU_IN), jnp.float32)
    params["gru_w_hh"] = s * jax.random.normal(next(keys), (3 * GRU_UNITS, GRU_UNITS), jnp.float32)
    params["gru_b_ih"] = s * jax.random.normal(next(keys), (3 * GRU_UNITS,), jnp.float32)
    params["gru_b_hh"] = s * jax.random.normal(next(keys), (3 * GRU_UNITS,), jnp.float32)
    return params


def _conv_as_dense(w, ci, ti, di):
    """Exact dense matrix of Conv2d(ci->co, k=KSIZE, stride=STRIDE, pad=PAD, bias=False)
    mapping the flat (t, c, d) input layout to the flat (t, c, d) output layout."""
    co = w.shape[0]
    to, do = _conv_out_len(ti), _conv_out_len(di)
    m = np.zeros((ti * ci * di, to * co * do), np.float32)
    ci_idx = np.arange(ci)
    co_idx = np.arange(co)
    for t_o in range(to):
        for ky in range(KSIZE):
            t_i = t_o * STRIDE + ky - PAD
            if not 0 <= t_i < ti:
                continue                              # zero-padding row
            for d_o in range(do):
                for kx in range(KSIZE):
                    d_i = d_o * STRIDE + kx - PAD
                    if not 0 <= d_i < di:
                        continue                      # zero-padding col
                    rows = (t_i * ci + ci_idx) * di + d_i
                    cols = (t_o * co + co_idx) * do + d_o
                    m[np.ix_(rows, cols)] = np.asarray(w[:, :, ky, kx]).T
    return m


def preprocess_params(params):
    """One-time exact parameter preprocessing:
      * lower each conv to a dense matmul and fold the eval-mode BN *scale* into its
        columns (only the additive shift remains in-kernel),
      * pack the GRU input-side weights into one lane-dense (T'*F, 3*T'*H) matrix
        (timestep selection embedded in the rows) plus a matching packed bias,
      * pack the GRU hidden-side weights into one (H, 3H) matrix plus packed bias."""
    ops = {}
    cin = 1
    for i, cout in enumerate(CONV_CHANS):
        ti, di = T_SIZES[i], D_SIZES[i]
        to, do = T_SIZES[i + 1], D_SIZES[i + 1]
        w = np.asarray(params[f"conv{i}_w"], np.float32)
        m = _conv_as_dense(w, cin, ti, di)
        gamma = np.asarray(params[f"bn{i}_gamma"], np.float32)
        beta = np.asarray(params[f"bn{i}_beta"], np.float32)
        mean = np.asarray(params[f"bn{i}_mean"], np.float32)
        var = np.asarray(params[f"bn{i}_var"], np.float32)
        sc = gamma / np.sqrt(var + BN_EPS)
        sh = beta - mean * sc
        sc_flat = np.ascontiguousarray(
            np.broadcast_to(sc[None, :, None], (to, cout, do))).reshape(1, -1)
        sh_flat = np.ascontiguousarray(
            np.broadcast_to(sh[None, :, None], (to, cout, do))).reshape(1, -1)
        ops[f"m{i}"] = jnp.asarray(m * sc_flat)       # BN scale folded into the conv matrix
        ops[f"b{i}"] = jnp.asarray(sh_flat)           # additive shift only
        cin = cout

    H, F = GRU_UNITS, GRU_IN
    w_ih = np.asarray(params["gru_w_ih"], np.float32)       # (3H, F), gate order r|z|n
    w_hh = np.asarray(params["gru_w_hh"], np.float32)       # (3H, H)
    b_ih = np.asarray(params["gru_b_ih"], np.float32)
    b_hh = np.asarray(params["gru_b_hh"], np.float32)

    # Packed input-side projection (one prologue matmul for all gates & timesteps).
    wi = np.zeros((T_OUT * F, GX_COLS), np.float32)
    bi = np.zeros((1, GX_COLS), np.float32)
    for g in range(3):
        wg_t = w_ih[g * H:(g + 1) * H, :].T                  # (F, H)
        bg = b_ih[g * H:(g + 1) * H]
        for t in range(T_OUT):
            c0 = (g * T_OUT + t) * H
            wi[t * F:(t + 1) * F, c0:c0 + H] = wg_t           # embed the timestep select
            bi[0, c0:c0 + H] = bg
    ops["wi"] = jnp.asarray(wi)
    ops["bi"] = jnp.asarray(bi)

    # Packed hidden-side projection (one matmul per GRU step).
    wh = np.concatenate([w_hh[g * H:(g + 1) * H, :].T for g in range(3)], axis=1)  # (H, 3H)
    bh = np.concatenate([b_hh[g * H:(g + 1) * H] for g in range(3)]).reshape(1, -1)
    ops["wh"] = jnp.asarray(wh)
    ops["bh"] = jnp.asarray(bh)
    return ops


# ---------------------------- plain-XLA reference ------------------------------
def reference_forward(speech, params):
    """Pure-JAX replica of the PyTorch OnnxReferenceEncoder forward (for checking)."""
    hi = jax.lax.Precision.HIGHEST
    x = speech[:, None, :, :].astype(jnp.float32)            # unsqueeze(1)
    for i in range(N_CONV):
        x = jax.lax.conv_general_dilated(
            x, params[f"conv{i}_w"], window_strides=(STRIDE, STRIDE),
            padding=((PAD, PAD), (PAD, PAD)),
            dimension_numbers=("NCHW", "OIHW", "NCHW"), precision=hi)
        sc = params[f"bn{i}_gamma"] / jnp.sqrt(params[f"bn{i}_var"] + BN_EPS)
        sh = params[f"bn{i}_beta"] - params[f"bn{i}_mean"] * sc
        x = jnp.maximum(x * sc[None, :, None, None] + sh[None, :, None, None], 0.0)
    hs = jnp.transpose(x, (0, 2, 1, 3)).reshape(B, T_OUT, GRU_IN)   # transpose(1,2).view
    H = GRU_UNITS
    wih_t = params["gru_w_ih"].T
    whh_t = params["gru_w_hh"].T
    h = jnp.zeros((B, H), jnp.float32)
    for t in range(T_OUT):
        gx = jnp.dot(hs[:, t, :], wih_t, precision=hi) + params["gru_b_ih"]
        gh = jnp.dot(h, whh_t, precision=hi) + params["gru_b_hh"]
        r = jax.nn.sigmoid(gx[:, :H] + gh[:, :H])
        z = jax.nn.sigmoid(gx[:, H:2 * H] + gh[:, H:2 * H])
        n = jnp.tanh(gx[:, 2 * H:] + r * gh[:, 2 * H:])
        h = (1.0 - z) * n + z * h
    return h


# ------------------------------------ main -------------------------------------
if __name__ == "__main__":
    root = jax.random.PRNGKey(0)
    pkey, skey = jax.random.split(root)
    params = init_torch_like_params(pkey)
    ops = preprocess_params(params)

    speech = jax.random.normal(skey, (B, T0, D0), jnp.float32)

    fwd = jax.jit(onnx_reference_encoder_forward)
    ref_embs = fwd(speech, ops)
    ref_embs = jax.block_until_ready(ref_embs)

    assert ref_embs.shape == (B, GRU_UNITS)
    assert bool(jnp.all(jnp.isfinite(ref_embs)))

    # Check against a plain-XLA replica.  Tolerance tightened vs. the previous 5e-2;
    # 1e-2 leaves headroom only for the EUP approximate reciprocal inside the sigmoid
    # (everything else is exact f32), while still catching real bugs (BN fold, packing).
    want = jax.jit(reference_forward)(speech, params)
    err = float(jnp.max(jnp.abs(ref_embs - want)))
    assert err < 1e-2, f"kernel/reference mismatch: max abs err {err}"

    print("KERNEL_OK")
</pallas_src>

<mosaic_0001>
module attributes {stable_mosaic.version = 11 : i64} {
  func.func @_ref_encoder_kernel(%arg0: i32, %arg1: memref<8x512xf32, #tpu.memory_space<vmem>>, %arg2: memref<512x512xf32, #tpu.memory_space<vmem>>, %arg3: memref<1x512xf32, #tpu.memory_space<vmem>>, %arg4: memref<1x256xf32, #tpu.memory_space<vmem>>, %arg5: memref<1x128xf32, #tpu.memory_space<vmem>>, %arg6: memref<32x96xf32, #tpu.memory_space<vmem>>, %arg7: memref<1x384xf32, #tpu.memory_space<vmem>>, %arg8: memref<1x96xf32, #tpu.memory_space<vmem>>, %arg9: memref<512x256xf32, #tpu.memory_space<any>>, %arg10: memref<256x128xf32, #tpu.memory_space<any>>, %arg11: memref<128x384xf32, #tpu.memory_space<any>>, %arg12: memref<8x32xf32, #tpu.memory_space<vmem>>, %arg13: memref<512x256xf32, #tpu.memory_space<vmem>>, %arg14: memref<256x128xf32, #tpu.memory_space<vmem>>, %arg15: memref<128x384xf32, #tpu.memory_space<vmem>>, %arg16: memref<3x!tpu.dma_semaphore, #tpu.memory_space<semaphore_mem>>) attributes {dimension_semantics = [#tpu.dimension_semantics<arbitrary>], iteration_bounds = array<i64: 1>, scalar_prefetch = 0 : i64, scratch_operands = 4 : i64, tpu.core_type = #tpu.core_type<tc>, window_params = [{pipeline_mode = #tpu.pipeline_mode<synchronous>, transform_indices = @transform_0, window_bounds = array<i64: 8, 512>}, {pipeline_mode = #tpu.pipeline_mode<synchronous>, transform_indices = @transform_1, window_bounds = array<i64: 512, 512>}, {pipeline_mode = #tpu.pipeline_mode<synchronous>, transform_indices = @transform_2, window_bounds = array<i64: 1, 512>}, {pipeline_mode = #tpu.pipeline_mode<synchronous>, transform_indices = @transform_3, window_bounds = array<i64: 1, 256>}, {pipeline_mode = #tpu.pipeline_mode<synchronous>, transform_indices = @transform_4, window_bounds = array<i64: 1, 128>}, {pipeline_mode = #tpu.pipeline_mode<synchronous>, transform_indices = @transform_5, window_bounds = array<i64: 32, 96>}, {pipeline_mode = #tpu.pipeline_mode<synchronous>, transform_indices = @transform_6, window_bounds = array<i64: 1, 384>}, {pipeline_mode = #tpu.pipeline_mode<synchronous>, transform_indices = @transform_7, window_bounds = array<i64: 1, 96>}, {}, {}, {}, {pipeline_mode = #tpu.pipeline_mode<synchronous>, transform_indices = @transform_11, window_bounds = array<i64: 8, 32>}]} {
    %c0_i32 = arith.constant 0 : i32
    %0 = tpu.memref_slice %arg16[%c0_i32] : memref<3x!tpu.dma_semaphore, #tpu.memory_space<semaphore_mem>> -> memref<1x!tpu.dma_semaphore, #tpu.memory_space<semaphore_mem>>
    %1 = tpu.memref_squeeze %0 : memref<1x!tpu.dma_semaphore, #tpu.memory_space<semaphore_mem>> -> memref<!tpu.dma_semaphore, #tpu.memory_space<semaphore_mem>>
    tpu.enqueue_dma source(%arg9 : memref<512x256xf32, #tpu.memory_space<any>>) target(%arg13 : memref<512x256xf32, #tpu.memory_space<vmem>>) target_semaphore(%1 : memref<!tpu.dma_semaphore, #tpu.memory_space<semaphore_mem>>)
    %c1_i32 = arith.constant 1 : i32
    %2 = tpu.memref_slice %arg16[%c1_i32] : memref<3x!tpu.dma_semaphore, #tpu.memory_space<semaphore_mem>> -> memref<1x!tpu.dma_semaphore, #tpu.memory_space<semaphore_mem>>
    %3 = tpu.memref_squeeze %2 : memref<1x!tpu.dma_semaphore, #tpu.memory_space<semaphore_mem>> -> memref<!tpu.dma_semaphore, #tpu.memory_space<semaphore_mem>>
    tpu.enqueue_dma source(%arg10 : memref<256x128xf32, #tpu.memory_space<any>>) target(%arg14 : memref<256x128xf32, #tpu.memory_space<vmem>>) target_semaphore(%3 : memref<!tpu.dma_semaphore, #tpu.memory_space<semaphore_mem>>)
    %c2_i32 = arith.constant 2 : i32
    %4 = tpu.memref_slice %arg16[%c2_i32] : memref<3x!tpu.dma_semaphore, #tpu.memory_space<semaphore_mem>> -> memref<1x!tpu.dma_semaphore, #tpu.memory_space<semaphore_mem>>
    %5 = tpu.memref_squeeze %4 : memref<1x!tpu.dma_semaphore, #tpu.memory_space<semaphore_mem>> -> memref<!tpu.dma_semaphore, #tpu.memory_space<semaphore_mem>>
    tpu.enqueue_dma source(%arg11 : memref<128x384xf32, #tpu.memory_space<any>>) target(%arg15 : memref<128x384xf32, #tpu.memory_space<vmem>>) target_semaphore(%5 : memref<!tpu.dma_semaphore, #tpu.memory_space<semaphore_mem>>)
    %c0 = arith.constant 0 : index
    %c0_0 = arith.constant 0 : index
    %6 = vector.load %arg1[%c0, %c0_0] : memref<8x512xf32, #tpu.memory_space<vmem>>, vector<8x512xf32>
    %c0_1 = arith.constant 0 : index
    %c0_2 = arith.constant 0 : index
    %7 = vector.load %arg2[%c0_1, %c0_2] : memref<512x512xf32, #tpu.memory_space<vmem>>, vector<512x512xf32>
    %cst = arith.constant dense<0.000000e+00> : vector<8x512xf32>
    %8 = tpu.matmul %6, %7, %cst {dimension_numbers = #tpu.dot_dimension_numbers<[1], [0], [0], [1], [0, 0, 1, 1], [], []>} : vector<8x512xf32>, vector<512x512xf32>, vector<8x512xf32> -> vector<8x512xf32>
    %c0_3 = arith.constant 0 : index
    %c0_4 = arith.constant 0 : index
    %9 = vector.load %arg3[%c0_3, %c0_4] : memref<1x512xf32, #tpu.memory_space<vmem>>, vector<1x512xf32>
    %10 = vector.broadcast %9 : vector<1x512xf32> to vector<8x512xf32>
    %11 = arith.addf %8, %10 : vector<8x512xf32>
    %cst_5 = arith.constant 0.000000e+00 : f32
    %12 = vector.broadcast %cst_5 : f32 to vector<8x512xf32>
    %13 = arith.maximumf %11, %12 : vector<8x512xf32>
    %c0_i32_6 = arith.constant 0 : i32
    %14 = tpu.memref_slice %arg16[%c0_i32_6] : memref<3x!tpu.dma_semaphore, #tpu.memory_space<semaphore_mem>> -> memref<1x!tpu.dma_semaphore, #tpu.memory_space<semaphore_mem>>
    %15 = tpu.memref_squeeze %14 : memref<1x!tpu.dma_semaphore, #tpu.memory_space<semaphore_mem>> -> memref<!tpu.dma_semaphore, #tpu.memory_space<semaphore_mem>>
    tpu.wait_dma2 semaphore(%15 : memref<!tpu.dma_semaphore, #tpu.memory_space<semaphore_mem>>) src(%arg9 : memref<512x256xf32, #tpu.memory_space<any>>) dst(%arg13 : memref<512x256xf32, #tpu.memory_space<vmem>>)
    %c0_7 = arith.constant 0 : index
    %c0_8 = arith.constant 0 : index
    %16 = vector.load %arg13[%c0_7, %c0_8] : memref<512x256xf32, #tpu.memory_space<vmem>>, vector<512x256xf32>
    %cst_9 = arith.constant dense<0.000000e+00> : vector<8x256xf32>
    %17 = tpu.matmul %13, %16, %cst_9 {dimension_numbers = #tpu.dot_dimension_numbers<[1], [0], [0], [1], [0, 0, 1, 1], [], []>} : vector<8x512xf32>, vector<512x256xf32>, vector<8x256xf32> -> vector<8x256xf32>
    %c0_10 = arith.constant 0 : index
    %c0_11 = arith.constant 0 : index
    %18 = vector.load %arg4[%c0_10, %c0_11] : memref<1x256xf32, #tpu.memory_space<vmem>>, vector<1x256xf32>
    %19 = vector.broadcast %18 : vector<1x256xf32> to vector<8x256xf32>
    %20 = arith.addf %17, %19 : vector<8x256xf32>
    %cst_12 = arith.constant 0.000000e+00 : f32
    %21 = vector.broadcast %cst_12 : f32 to vector<8x256xf32>
    %22 = arith.maximumf %20, %21 : vector<8x256xf32>
    %c1_i32_13 = arith.constant 1 : i32
    %23 = tpu.memref_slice %arg16[%c1_i32_13] : memref<3x!tpu.dma_semaphore, #tpu.memory_space<semaphore_mem>> -> memref<1x!tpu.dma_semaphore, #tpu.memory_space<semaphore_mem>>
    %24 = tpu.memref_squeeze %23 : memref<1x!tpu.dma_semaphore, #tpu.memory_space<semaphore_mem>> -> memref<!tpu.dma_semaphore, #tpu.memory_space<semaphore_mem>>
    tpu.wait_dma2 semaphore(%24 : memref<!tpu.dma_semaphore, #tpu.memory_space<semaphore_mem>>) src(%arg10 : memref<256x128xf32, #tpu.memory_space<any>>) dst(%arg14 : memref<256x128xf32, #tpu.memory_space<vmem>>)
    %c0_14 = arith.constant 0 : index
    %c0_15 = arith.constant 0 : index
    %25 = vector.load %arg14[%c0_14, %c0_15] : memref<256x128xf32, #tpu.memory_space<vmem>>, vector<256x128xf32>
    %cst_16 = arith.constant dense<0.000000e+00> : vector<8x128xf32>
    %26 = tpu.matmul %22, %25, %cst_16 {dimension_numbers = #tpu.dot_dimension_numbers<[1], [0], [0], [1], [0, 0, 1, 1], [], []>} : vector<8x256xf32>, vector<256x128xf32>, vector<8x128xf32> -> vector<8x128xf32>
    %c0_17 = arith.constant 0 : index
    %c0_18 = arith.constant 0 : index
    %27 = vector.load %arg5[%c0_17, %c0_18] : memref<1x128xf32, #tpu.memory_space<vmem>>, vector<1x128xf32>
    %28 = vector.broadcast %27 : vector<1x128xf32> to vector<8x128xf32>
    %29 = arith.addf %26, %28 : vector<8x128xf32>
    %cst_19 = arith.constant 0.000000e+00 : f32
    %30 = vector.broadcast %cst_19 : f32 to vector<8x128xf32>
    %31 = arith.maximumf %29, %30 : vector<8x128xf32>
    %c2_i32_20 = arith.constant 2 : i32
    %32 = tpu.memref_slice %arg16[%c2_i32_20] : memref<3x!tpu.dma_semaphore, #tpu.memory_space<semaphore_mem>> -> memref<1x!tpu.dma_semaphore, #tpu.memory_space<semaphore_mem>>
    %33 = tpu.memref_squeeze %32 : memref<1x!tpu.dma_semaphore, #tpu.memory_space<semaphore_mem>> -> memref<!tpu.dma_semaphore, #tpu.memory_space<semaphore_mem>>
    tpu.wait_dma2 semaphore(%33 : memref<!tpu.dma_semaphore, #tpu.memory_space<semaphore_mem>>) src(%arg11 : memref<128x384xf32, #tpu.memory_space<any>>) dst(%arg15 : memref<128x384xf32, #tpu.memory_space<vmem>>)
    %c0_21 = arith.constant 0 : index
    %c0_22 = arith.constant 0 : index
    %34 = vector.load %arg15[%c0_21, %c0_22] : memref<128x384xf32, #tpu.memory_space<vmem>>, vector<128x384xf32>
    %cst_23 = arith.constant dense<0.000000e+00> : vector<8x384xf32>
    %35 = tpu.matmul %31, %34, %cst_23 {dimension_numbers = #tpu.dot_dimension_numbers<[1], [0], [0], [1], [0, 0, 1, 1], [], []>} : vector<8x128xf32>, vector<128x384xf32>, vector<8x384xf32> -> vector<8x384xf32>
    %c0_24 = arith.constant 0 : index
    %c0_25 = arith.constant 0 : index
    %36 = vector.load %arg7[%c0_24, %c0_25] : memref<1x384xf32, #tpu.memory_space<vmem>>, vector<1x384xf32>
    %37 = vector.broadcast %36 : vector<1x384xf32> to vector<8x384xf32>
    %38 = arith.addf %35, %37 : vector<8x384xf32>
    %cst_26 = arith.constant 0.000000e+00 : f32
    %39 = vector.broadcast %cst_26 : f32 to vector<8x32xf32>
    %c0_27 = arith.constant 0 : index
    %c0_28 = arith.constant 0 : index
    %40 = vector.load %arg6[%c0_27, %c0_28] : memref<32x96xf32, #tpu.memory_space<vmem>>, vector<32x96xf32>
    %cst_29 = arith.constant dense<0.000000e+00> : vector<8x96xf32>
    %41 = tpu.matmul %39, %40, %cst_29 {dimension_numbers = #tpu.dot_dimension_numbers<[1], [0], [0], [1], [0, 0, 1, 1], [], []>} : vector<8x32xf32>, vector<32x96xf32>, vector<8x96xf32> -> vector<8x96xf32>
    %c0_30 = arith.constant 0 : index
    %c0_31 = arith.constant 0 : index
    %42 = vector.load %arg8[%c0_30, %c0_31] : memref<1x96xf32, #tpu.memory_space<vmem>>, vector<1x96xf32>
    %43 = vector.broadcast %42 : vector<1x96xf32> to vector<8x96xf32>
    %44 = arith.addf %41, %43 : vector<8x96xf32>
    %45 = vector.extract_strided_slice %38 {offsets = [0, 0], sizes = [8, 32], strides = [1, 1]} : vector<8x384xf32> to vector<8x32xf32>
    %46 = vector.extract_strided_slice %38 {offsets = [0, 128], sizes = [8, 32], strides = [1, 1]} : vector<8x384xf32> to vector<8x32xf32>
    %47 = vector.extract_strided_slice %38 {offsets = [0, 256], sizes = [8, 32], strides = [1, 1]} : vector<8x384xf32> to vector<8x32xf32>
    %48 = vector.extract_strided_slice %44 {offsets = [0, 0], sizes = [8, 32], strides = [1, 1]} : vector<8x96xf32> to vector<8x32xf32>
    %49 = arith.addf %45, %48 : vector<8x32xf32>
    %cst_32 = arith.constant 0.000000e+00 : f32
    %50 = vector.broadcast %cst_32 : f32 to vector<8x32xf32>
    %51 = arith.subf %50, %49 : vector<8x32xf32>
    %52 = math.exp %51 : vector<8x32xf32>
    %cst_33 = arith.constant 1.000000e+00 : f32
    %53 = vector.broadcast %cst_33 : f32 to vector<8x32xf32>
    %54 = arith.addf %53, %52 : vector<8x32xf32>
    %55 = tpu.reciprocal %54 {approx = true} : vector<8x32xf32> -> vector<8x32xf32>
    %56 = vector.extract_strided_slice %44 {offsets = [0, 32], sizes = [8, 32], strides = [1, 1]} : vector<8x96xf32> to vector<8x32xf32>
    %57 = arith.addf %46, %56 : vector<8x32xf32>
    %cst_34 = arith.constant 0.000000e+00 : f32
    %58 = vector.broadcast %cst_34 : f32 to vector<8x32xf32>
    %59 = arith.subf %58, %57 : vector<8x32xf32>
    %60 = math.exp %59 : vector<8x32xf32>
    %cst_35 = arith.constant 1.000000e+00 : f32
    %61 = vector.broadcast %cst_35 : f32 to vector<8x32xf32>
    %62 = arith.addf %61, %60 : vector<8x32xf32>
    %63 = tpu.reciprocal %62 {approx = true} : vector<8x32xf32> -> vector<8x32xf32>
    %64 = vector.extract_strided_slice %44 {offsets = [0, 64], sizes = [8, 32], strides = [1, 1]} : vector<8x96xf32> to vector<8x32xf32>
    %65 = arith.mulf %55, %64 : vector<8x32xf32>
    %66 = arith.addf %47, %65 : vector<8x32xf32>
    %67 = math.tanh %66 : vector<8x32xf32>
    %68 = arith.subf %39, %67 : vector<8x32xf32>
    %69 = arith.mulf %63, %68 : vector<8x32xf32>
    %70 = arith.addf %67, %69 : vector<8x32xf32>
    %c0_36 = arith.constant 0 : index
    %c0_37 = arith.constant 0 : index
    %71 = vector.load %arg6[%c0_36, %c0_37] : memref<32x96xf32, #tpu.memory_space<vmem>>, vector<32x96xf32>
    %cst_38 = arith.constant dense<0.000000e+00> : vector<8x96xf32>
    %72 = tpu.matmul %70, %71, %cst_38 {dimension_numbers = #tpu.dot_dimension_numbers<[1], [0], [0], [1], [0, 0, 1, 1], [], []>} : vector<8x32xf32>, vector<32x96xf32>, vector<8x96xf32> -> vector<8x96xf32>
    %c0_39 = arith.constant 0 : index
    %c0_40 = arith.constant 0 : index
    %73 = vector.load %arg8[%c0_39, %c0_40] : memref<1x96xf32, #tpu.memory_space<vmem>>, vector<1x96xf32>
    %74 = vector.broadcast %73 : vector<1x96xf32> to vector<8x96xf32>
    %75 = arith.addf %72, %74 : vector<8x96xf32>
    %76 = vector.extract_strided_slice %38 {offsets = [0, 32], sizes = [8, 32], strides = [1, 1]} : vector<8x384xf32> to vector<8x32xf32>
    %77 = vector.extract_strided_slice %38 {offsets = [0, 160], sizes = [8, 32], strides = [1, 1]} : vector<8x384xf32> to vector<8x32xf32>
    %78 = vector.extract_strided_slice %38 {offsets = [0, 288], sizes = [8, 32], strides = [1, 1]} : vector<8x384xf32> to vector<8x32xf32>
    %79 = vector.extract_strided_slice %75 {offsets = [0, 0], sizes = [8, 32], strides = [1, 1]} : vector<8x96xf32> to vector<8x32xf32>
    %80 = arith.addf %76, %79 : vector<8x32xf32>
    %cst_41 = arith.constant 0.000000e+00 : f32
    %81 = vector.broadcast %cst_41 : f32 to vector<8x32xf32>
    %82 = arith.subf %81, %80 : vector<8x32xf32>
    %83 = math.exp %82 : vector<8x32xf32>
    %cst_42 = arith.constant 1.000000e+00 : f32
    %84 = vector.broadcast %cst_42 : f32 to vector<8x32xf32>
    %85 = arith.addf %84, %83 : vector<8x32xf32>
    %86 = tpu.reciprocal %85 {approx = true} : vector<8x32xf32> -> vector<8x32xf32>
    %87 = vector.extract_strided_slice %75 {offsets = [0, 32], sizes = [8, 32], strides = [1, 1]} : vector<8x96xf32> to vector<8x32xf32>
    %88 = arith.addf %77, %87 : vector<8x32xf32>
    %cst_43 = arith.constant 0.000000e+00 : f32
    %89 = vector.broadcast %cst_43 : f32 to vector<8x32xf32>
    %90 = arith.subf %89, %88 : vector<8x32xf32>
    %91 = math.exp %90 : vector<8x32xf32>
    %cst_44 = arith.constant 1.000000e+00 : f32
    %92 = vector.broadcast %cst_44 : f32 to vector<8x32xf32>
    %93 = arith.addf %92, %91 : vector<8x32xf32>
    %94 = tpu.reciprocal %93 {approx = true} : vector<8x32xf32> -> vector<8x32xf32>
    %95 = vector.extract_strided_slice %75 {offsets = [0, 64], sizes = [8, 32], strides = [1, 1]} : vector<8x96xf32> to vector<8x32xf32>
    %96 = arith.mulf %86, %95 : vector<8x32xf32>
    %97 = arith.addf %78, %96 : vector<8x32xf32>
    %98 = math.tanh %97 : vector<8x32xf32>
    %99 = arith.subf %70, %98 : vector<8x32xf32>
    %100 = arith.mulf %94, %99 : vector<8x32xf32>
    %101 = arith.addf %98, %100 : vector<8x32xf32>
    %c0_45 = arith.constant 0 : index
    %c0_46 = arith.constant 0 : index
    %102 = vector.load %arg6[%c0_45, %c0_46] : memref<32x96xf32, #tpu.memory_space<vmem>>, vector<32x96xf32>
    %cst_47 = arith.constant dense<0.000000e+00> : vector<8x96xf32>
    %103 = tpu.matmul %101, %102, %cst_47 {dimension_numbers = #tpu.dot_dimension_numbers<[1], [0], [0], [1], [0, 0, 1, 1], [], []>} : vector<8x32xf32>, vector<32x96xf32>, vector<8x96xf32> -> vector<8x96xf32>
    %c0_48 = arith.constant 0 : index
    %c0_49 = arith.constant 0 : index
    %104 = vector.load %arg8[%c0_48, %c0_49] : memref<1x96xf32, #tpu.memory_space<vmem>>, vector<1x96xf32>
    %105 = vector.broadcast %104 : vector<1x96xf32> to vector<8x96xf32>
    %106 = arith.addf %103, %105 : vector<8x96xf32>
    %107 = vector.extract_strided_slice %38 {offsets = [0, 64], sizes = [8, 32], strides = [1, 1]} : vector<8x384xf32> to vector<8x32xf32>
    %108 = vector.extract_strided_slice %38 {offsets = [0, 192], sizes = [8, 32], strides = [1, 1]} : vector<8x384xf32> to vector<8x32xf32>
    %109 = vector.extract_strided_slice %38 {offsets = [0, 320], sizes = [8, 32], strides = [1, 1]} : vector<8x384xf32> to vector<8x32xf32>
    %110 = vector.extract_strided_slice %106 {offsets = [0, 0], sizes = [8, 32], strides = [1, 1]} : vector<8x96xf32> to vector<8x32xf32>
    %111 = arith.addf %107, %110 : vector<8x32xf32>
    %cst_50 = arith.constant 0.000000e+00 : f32
    %112 = vector.broadcast %cst_50 : f32 to vector<8x32xf32>
    %113 = arith.subf %112, %111 : vector<8x32xf32>
    %114 = math.exp %113 : vector<8x32xf32>
    %cst_51 = arith.constant 1.000000e+00 : f32
    %115 = vector.broadcast %cst_51 : f32 to vector<8x32xf32>
    %116 = arith.addf %115, %114 : vector<8x32xf32>
    %117 = tpu.reciprocal %116 {approx = true} : vector<8x32xf32> -> vector<8x32xf32>
    %118 = vector.extract_strided_slice %106 {offsets = [0, 32], sizes = [8, 32], strides = [1, 1]} : vector<8x96xf32> to vector<8x32xf32>
    %119 = arith.addf %108, %118 : vector<8x32xf32>
    %cst_52 = arith.constant 0.000000e+00 : f32
    %120 = vector.broadcast %cst_52 : f32 to vector<8x32xf32>
    %121 = arith.subf %120, %119 : vector<8x32xf32>
    %122 = math.exp %121 : vector<8x32xf32>
    %cst_53 = arith.constant 1.000000e+00 : f32
    %123 = vector.broadcast %cst_53 : f32 to vector<8x32xf32>
    %124 = arith.addf %123, %122 : vector<8x32xf32>
    %125 = tpu.reciprocal %124 {approx = true} : vector<8x32xf32> -> vector<8x32xf32>
    %126 = vector.extract_strided_slice %106 {offsets = [0, 64], sizes = [8, 32], strides = [1, 1]} : vector<8x96xf32> to vector<8x32xf32>
    %127 = arith.mulf %117, %126 : vector<8x32xf32>
    %128 = arith.addf %109, %127 : vector<8x32xf32>
    %129 = math.tanh %128 : vector<8x32xf32>
    %130 = arith.subf %101, %129 : vector<8x32xf32>
    %131 = arith.mulf %125, %130 : vector<8x32xf32>
    %132 = arith.addf %129, %131 : vector<8x32xf32>
    %c0_54 = arith.constant 0 : index
    %c0_55 = arith.constant 0 : index
    %133 = vector.load %arg6[%c0_54, %c0_55] : memref<32x96xf32, #tpu.memory_space<vmem>>, vector<32x96xf32>
    %cst_56 = arith.constant dense<0.000000e+00> : vector<8x96xf32>
    %134 = tpu.matmul %132, %133, %cst_56 {dimension_numbers = #tpu.dot_dimension_numbers<[1], [0], [0], [1], [0, 0, 1, 1], [], []>} : vector<8x32xf32>, vector<32x96xf32>, vector<8x96xf32> -> vector<8x96xf32>
    %c0_57 = arith.constant 0 : index
    %c0_58 = arith.constant 0 : index
    %135 = vector.load %arg8[%c0_57, %c0_58] : memref<1x96xf32, #tpu.memory_space<vmem>>, vector<1x96xf32>
    %136 = vector.broadcast %135 : vector<1x96xf32> to vector<8x96xf32>
    %137 = arith.addf %134, %136 : vector<8x96xf32>
    %138 = vector.extract_strided_slice %38 {offsets = [0, 96], sizes = [8, 32], strides = [1, 1]} : vector<8x384xf32> to vector<8x32xf32>
    %139 = vector.extract_strided_slice %38 {offsets = [0, 224], sizes = [8, 32], strides = [1, 1]} : vector<8x384xf32> to vector<8x32xf32>
    %140 = vector.extract_strided_slice %38 {offsets = [0, 352], sizes = [8, 32], strides = [1, 1]} : vector<8x384xf32> to vector<8x32xf32>
    %141 = vector.extract_strided_slice %137 {offsets = [0, 0], sizes = [8, 32], strides = [1, 1]} : vector<8x96xf32> to vector<8x32xf32>
    %142 = arith.addf %138, %141 : vector<8x32xf32>
    %cst_59 = arith.constant 0.000000e+00 : f32
    %143 = vector.broadcast %cst_59 : f32 to vector<8x32xf32>
    %144 = arith.subf %143, %142 : vector<8x32xf32>
    %145 = math.exp %144 : vector<8x32xf32>
    %cst_60 = arith.constant 1.000000e+00 : f32
    %146 = vector.broadcast %cst_60 : f32 to vector<8x32xf32>
    %147 = arith.addf %146, %145 : vector<8x32xf32>
    %148 = tpu.reciprocal %147 {approx = true} : vector<8x32xf32> -> vector<8x32xf32>
    %149 = vector.extract_strided_slice %137 {offsets = [0, 32], sizes = [8, 32], strides = [1, 1]} : vector<8x96xf32> to vector<8x32xf32>
    %150 = arith.addf %139, %149 : vector<8x32xf32>
    %cst_61 = arith.constant 0.000000e+00 : f32
    %151 = vector.broadcast %cst_61 : f32 to vector<8x32xf32>
    %152 = arith.subf %151, %150 : vector<8x32xf32>
    %153 = math.exp %152 : vector<8x32xf32>
    %cst_62 = arith.constant 1.000000e+00 : f32
    %154 = vector.broadcast %cst_62 : f32 to vector<8x32xf32>
    %155 = arith.addf %154, %153 : vector<8x32xf32>
    %156 = tpu.reciprocal %155 {approx = true} : vector<8x32xf32> -> vector<8x32xf32>
    %157 = vector.extract_strided_slice %137 {offsets = [0, 64], sizes = [8, 32], strides = [1, 1]} : vector<8x96xf32> to vector<8x32xf32>
    %158 = arith.mulf %148, %157 : vector<8x32xf32>
    %159 = arith.addf %140, %158 : vector<8x32xf32>
    %160 = math.tanh %159 : vector<8x32xf32>
    %161 = arith.subf %132, %160 : vector<8x32xf32>
    %162 = arith.mulf %156, %161 : vector<8x32xf32>
    %163 = arith.addf %160, %162 : vector<8x32xf32>
    %c0_63 = arith.constant 0 : index
    %c0_64 = arith.constant 0 : index
    %164 = vector.load %arg12[%c0_63, %c0_64] : memref<8x32xf32, #tpu.memory_space<vmem>>, vector<8x32xf32>
    tpu.vector_store %arg12[%c0_63, %c0_64], %163 {strides = array<i32>} : memref<8x32xf32, #tpu.memory_space<vmem>>, vector<8x32xf32>,
    return
  }
  func.func @transform_0(%arg0: i32) -> (i32, i32) {
    %c0_i32 = arith.constant 0 : i32
    %c0_i32_0 = arith.constant 0 : i32
    %c0_i32_1 = arith.constant 0 : i32
    return %c0_i32, %c0_i32_0 : i32, i32
  }
  func.func @transform_1(%arg0: i32) -> (i32, i32) {
    %c0_i32 = arith.constant 0 : i32
    %c0_i32_0 = arith.constant 0 : i32
    %c0_i32_1 = arith.constant 0 : i32
    return %c0_i32, %c0_i32_0 : i32, i32
  }
  func.func @transform_2(%arg0: i32) -> (i32, i32) {
    %c0_i32 = arith.constant 0 : i32
    %c0_i32_0 = arith.constant 0 : i32
    %c0_i32_1 = arith.constant 0 : i32
    return %c0_i32, %c0_i32_0 : i32, i32
  }
  func.func @transform_3(%arg0: i32) -> (i32, i32) {
    %c0_i32 = arith.constant 0 : i32
    %c0_i32_0 = arith.constant 0 : i32
    %c0_i32_1 = arith.constant 0 : i32
    return %c0_i32, %c0_i32_0 : i32, i32
  }
  func.func @transform_4(%arg0: i32) -> (i32, i32) {
    %c0_i32 = arith.constant 0 : i32
    %c0_i32_0 = arith.constant 0 : i32
    %c0_i32_1 = arith.constant 0 : i32
    return %c0_i32, %c0_i32_0 : i32, i32
  }
  func.func @transform_5(%arg0: i32) -> (i32, i32) {
    %c0_i32 = arith.constant 0 : i32
    %c0_i32_0 = arith.constant 0 : i32
    %c0_i32_1 = arith.constant 0 : i32
    return %c0_i32, %c0_i32_0 : i32, i32
  }
  func.func @transform_6(%arg0: i32) -> (i32, i32) {
    %c0_i32 = arith.constant 0 : i32
    %c0_i32_0 = arith.constant 0 : i32
    %c0_i32_1 = arith.constant 0 : i32
    return %c0_i32, %c0_i32_0 : i32, i32
  }
  func.func @transform_7(%arg0: i32) -> (i32, i32) {
    %c0_i32 = arith.constant 0 : i32
    %c0_i32_0 = arith.constant 0 : i32
    %c0_i32_1 = arith.constant 0 : i32
    return %c0_i32, %c0_i32_0 : i32, i32
  }
  func.func @transform_11(%arg0: i32) -> (i32, i32) {
    %c0_i32 = arith.constant 0 : i32
    %c0_i32_0 = arith.constant 0 : i32
    %c0_i32_1 = arith.constant 0 : i32
    return %c0_i32, %c0_i32_0 : i32, i32
  }
}

</mosaic_0001>

<bundles_post_ra>
// kernel: onnx_reference_encoder_forward.1
= control target key start
LH: loop header
LB: loop body
LE: loop exit
PB: predicated region body
PF: predicated region fallthrough
CT: control target
= control target key end

     0   :  { %16 = vsyncpa [#allocation7], 0  ;;  %s1606_s20 = smov [#allocation6]   ;;  %s1607_s22 = smov 512   ;;  %s1867_s0 = inlined_call_operand.vmem [shape: f32[8,512], index: 0, kind: input, shape index: {}]   ;;  %s1868_s1 = inlined_call_operand.hbm [shape: f32[512,512], index: 1, kind: input, shape index: {}]   ;;  %s1869_s2 = inlined_call_operand.vmem [shape: f32[1,512], index: 2, kind: input, shape index: {}]   ;;  %s1870_s3 = inlined_call_operand.vmem [shape: f32[1,256], index: 3, kind: input, shape index: {}]   ;;  %s1871_s4 = inlined_call_operand.vmem [shape: f32[1,128], index: 4, kind: input, shape index: {}]   ;;  %s1872_s5 = inlined_call_operand.vmem [shape: f32[32,96], index: 5, kind: input, shape index: {}]   ;;  %s1873_s6 = inlined_call_operand.vmem [shape: f32[1,384], index: 6, kind: input, shape index: {}]   ;;  %s1874_s7 = inlined_call_operand.vmem [shape: f32[1,96], index: 7, kind: input, shape index: {}]   ;;  %s1875_s8 = inlined_call_operand.hbm [shape: f32[512,256], index: 8, kind: input, shape index: {}]   ;;  %s1876_s9 = inlined_call_operand.hbm [shape: f32[256,128], index: 9, kind: input, shape index: {}]   ;;  %s1877_s10 = inlined_call_operand.hbm [shape: f32[128,384], index: 10, kind: input, shape index: {}]   ;;  %s1878_s11 = inlined_call_operand.vmem [shape: f32[8,32], index: 11, kind: output, shape index: {}]  }
   0x1   :  { %s23_s19 = sshll.u32 %s1868_s1, 4  ;;  %s25_s21 = sshll.u32 %s1606_s20, 4  ;;  %s24_s19 = int_to_ptr.hbm [resolvable:$true] %s23_s19  ;;  %s26_s21 = int_to_ptr.vmem [resolvable:$true] %s25_s21 }
   0x2   :  { %s1608_s23 = smov 32  }
   0x3   :  { %31 = dma.hbm_to_vmem [thread:$0]  %s24_s19, 32768, %s26_s21, [#allocation7], %s1607_s22, %s1607_s22, %s1608_s23  }
   0x4   :  { %1598 = dma.done.wait [#allocation7], 32768  }
   0x5   :  { %1599 = vsyncadd [#allocation7], 4294934528  ;;  %v281_v0 = vld [vmem:[#allocation6 + $0x5e0] sm:$0xff]  ;;  %v282_v62 = vld [vmem:[#allocation6 + $0x5e8] sm:$0xff]  ;;  %s55_s13 = sshll.u32 %s1875_s8, 4  ;;  %s1609_s14 = smov [#allocation2]   ;;  %s56_s13 = int_to_ptr.hbm [resolvable:$true] %s55_s13 }
   0x6   :  { %v153_v1 = vld [vmem:[#allocation6 + $0x1e0] sm:$0xff]  ;;  %399 = vmatpush.msra.mxu2 %v281_v0  ;;  %v154_v0 = vld [vmem:[#allocation6 + $0x1e8] sm:$0xff]  ;;  %s57_s15 = sshll.u32 %s1609_s14, 4  ;;  %s69_s18 = sshll.u32 %s1876_s9, 4  ;;  %s58_s15 = int_to_ptr.vmem [resolvable:$true] %s57_s15  ;;  %s70_s18 = int_to_ptr.hbm [resolvable:$true] %s69_s18 }
   0x7   :  { %v277_v2 = vld [vmem:[#allocation6 + $0x5c0] sm:$0xff]  ;;  %359 = vmatpush.msra.mxu0 %v153_v1  ;;  %v346_v1 = vld [vmem:[#allocation6 + $0x7e8] sm:$0xff]  ;;  %60 = dma.hbm_to_vmem [thread:$0]  %s56_s13, 16384, %s58_s15, [#allocation5] }
   0x8   :  { %v345_v3 = vld [vmem:[#allocation6 + $0x7e0] sm:$0xff]  ;;  %400 = vmatpush.msra.mxu2 %v277_v2  ;;  %v278_v2 = vld [vmem:[#allocation6 + $0x5c8] sm:$0xff]  ;;  %s1610_s19 = smov [#allocation3]   ;;  %s83_s1 = sshll.u32 %s1877_s10, 4  ;;  %s84_s1 = int_to_ptr.hbm [resolvable:$true] %s83_s1 }
   0x9   :  { %v149_v4 = vld [vmem:[#allocation6 + $0x1c0] sm:$0xff]  ;;  %419 = vmatpush.msra.mxu3 %v345_v3  ;;  %s71_s20 = sshll.u32 %s1610_s19, 4  ;;  %s1611_s8 = smov [#allocation4]   ;;  %s72_s20 = int_to_ptr.vmem [resolvable:$true] %s71_s20 }
   0xa   :  { %v217_v5 = vld [vmem:[#allocation6 + $0x3e0] sm:$0xff]  ;;  %360 = vmatpush.msra.mxu0 %v149_v4  ;;  %v150_v4 = vld [vmem:[#allocation6 + $0x1c8] sm:$0xff]  ;;  %74 = dma.hbm_to_vmem [thread:$0]  %s70_s18, 4096, %s72_s20, [#allocation5 + $0x1] }
   0xb   :  { %379 = vmatpush.msra.mxu1 %v217_v5  ;;  %v273_v6 = vld [vmem:[#allocation6 + $0x5a0] sm:$0xff]  ;;  %v218_v5 = vld [vmem:[#allocation6 + $0x3e8] sm:$0xff]  ;;  %s85_s24 = sshll.u32 %s1611_s8, 4  ;;  %s86_s24 = int_to_ptr.vmem [resolvable:$true] %s85_s24 }
   0xc   :  { %v341_v7 = vld [vmem:[#allocation6 + $0x7c0] sm:$0xff]  ;;  %401 = vmatpush.msra.mxu2 %v273_v6  ;;  %v274_v6 = vld [vmem:[#allocation6 + $0x5a8] sm:$0xff]  ;;  %88 = dma.hbm_to_vmem [thread:$0]  %s84_s1, 6144, %s86_s24, [#allocation5 + $0x2] }
   0xd   :  { %v145_v8 = vld [vmem:[#allocation6 + $0x1a0] sm:$0xff]  ;;  %420 = vmatpush.msra.mxu3 %v341_v7  ;;  %v342_v7 = vld [vmem:[#allocation6 + $0x7c8] sm:$0xff] }
   0xe   :  { %v213_v9 = vld [vmem:[#allocation6 + $0x3c0] sm:$0xff]  ;;  %361 = vmatpush.msra.mxu0 %v145_v8  ;;  %v146_v8 = vld [vmem:[#allocation6 + $0x1a8] sm:$0xff] }
   0xf   :  { %v337_v10 = vld [vmem:[#allocation6 + $0x7a0] sm:$0xff]  ;;  %380 = vmatpush.msra.mxu1 %v213_v9  ;;  %v214_v9 = vld [vmem:[#allocation6 + $0x3c8] sm:$0xff] }
  0x10   :  { %v269_v11 = vld [vmem:[#allocation6 + $0x580] sm:$0xff]  ;;  %421 = vmatpush.msra.mxu3 %v337_v10  ;;  %v270_v10 = vld [vmem:[#allocation6 + $0x588] sm:$0xff] }
  0x11   :  { %v141_v12 = vld [vmem:[#allocation6 + $0x180] sm:$0xff]  ;;  %402 = vmatpush.msra.mxu2 %v269_v11  ;;  %v338_v11 = vld [vmem:[#allocation6 + $0x7a8] sm:$0xff] }
  0x12   :  { %v209_v13 = vld [vmem:[#allocation6 + $0x3a0] sm:$0xff]  ;;  %362 = vmatpush.msra.mxu0 %v141_v12  ;;  %v142_v12 = vld [vmem:[#allocation6 + $0x188] sm:$0xff] }
  0x13   :  { %v333_v14 = vld [vmem:[#allocation6 + $0x780] sm:$0xff]  ;;  %381 = vmatpush.msra.mxu1 %v209_v13  ;;  %v210_v13 = vld [vmem:[#allocation6 + $0x3a8] sm:$0xff] }
  0x14   :  { %v205_v15 = vld [vmem:[#allocation6 + $0x380] sm:$0xff]  ;;  %422 = vmatpush.msra.mxu3 %v333_v14  ;;  %v266_v14 = vld [vmem:[#allocation6 + $0x568] sm:$0xff] }
  0x15   :  { %v265_v16 = vld [vmem:[#allocation6 + $0x560] sm:$0xff]  ;;  %382 = vmatpush.msra.mxu1 %v205_v15  ;;  %v334_v15 = vld [vmem:[#allocation6 + $0x788] sm:$0xff] }
  0x16   :  { %v137_v17 = vld [vmem:[#allocation6 + $0x160] sm:$0xff]  ;;  %403 = vmatpush.msra.mxu2 %v265_v16  ;;  %v138_v16 = vld [vmem:[#allocation6 + $0x168] sm:$0xff] }
  0x17   :  { %v329_v18 = vld [vmem:[#allocation6 + $0x760] sm:$0xff]  ;;  %363 = vmatpush.msra.mxu0 %v137_v17  ;;  %v206_v17 = vld [vmem:[#allocation6 + $0x388] sm:$0xff] }
  0x18   :  { %v201_v19 = vld [vmem:[#allocation6 + $0x360] sm:$0xff]  ;;  %423 = vmatpush.msra.mxu3 %v329_v18  ;;  %v262_v18 = vld [vmem:[#allocation6 + $0x548] sm:$0xff] }
  0x19   :  { %v261_v20 = vld [vmem:[#allocation6 + $0x540] sm:$0xff]  ;;  %383 = vmatpush.msra.mxu1 %v201_v19  ;;  %v330_v19 = vld [vmem:[#allocation6 + $0x768] sm:$0xff] }
  0x1a   :  { %v133_v21 = vld [vmem:[#allocation6 + $0x140] sm:$0xff]  ;;  %404 = vmatpush.msra.mxu2 %v261_v20  ;;  %v134_v20 = vld [vmem:[#allocation6 + $0x148] sm:$0xff] }
  0x1b   :  { %v325_v22 = vld [vmem:[#allocation6 + $0x740] sm:$0xff]  ;;  %364 = vmatpush.msra.mxu0 %v133_v21  ;;  %v202_v21 = vld [vmem:[#allocation6 + $0x368] sm:$0xff] }
  0x1c   :  { %v197_v23 = vld [vmem:[#allocation6 + $0x340] sm:$0xff]  ;;  %424 = vmatpush.msra.mxu3 %v325_v22  ;;  %v258_v22 = vld [vmem:[#allocation6 + $0x528] sm:$0xff] }
  0x1d   :  { %v257_v24 = vld [vmem:[#allocation6 + $0x520] sm:$0xff]  ;;  %384 = vmatpush.msra.mxu1 %v197_v23  ;;  %v326_v23 = vld [vmem:[#allocation6 + $0x748] sm:$0xff] }
  0x1e   :  { %v129_v25 = vld [vmem:[#allocation6 + $0x120] sm:$0xff]  ;;  %405 = vmatpush.msra.mxu2 %v257_v24  ;;  %v130_v24 = vld [vmem:[#allocation6 + $0x128] sm:$0xff] }
  0x1f   :  { %v321_v26 = vld [vmem:[#allocation6 + $0x720] sm:$0xff]  ;;  %365 = vmatpush.msra.mxu0 %v129_v25  ;;  %v198_v25 = vld [vmem:[#allocation6 + $0x348] sm:$0xff] }
  0x20   :  { %v193_v27 = vld [vmem:[#allocation6 + $0x320] sm:$0xff]  ;;  %425 = vmatpush.msra.mxu3 %v321_v26  ;;  %v254_v26 = vld [vmem:[#allocation6 + $0x508] sm:$0xff] }
  0x21   :  { %v253_v28 = vld [vmem:[#allocation6 + $0x500] sm:$0xff]  ;;  %385 = vmatpush.msra.mxu1 %v193_v27  ;;  %v322_v27 = vld [vmem:[#allocation6 + $0x728] sm:$0xff] }
  0x22   :  { %v125_v29 = vld [vmem:[#allocation6 + $0x100] sm:$0xff]  ;;  %406 = vmatpush.msra.mxu2 %v253_v28  ;;  %v126_v28 = vld [vmem:[#allocation6 + $0x108] sm:$0xff] }
  0x23   :  { %v317_v30 = vld [vmem:[#allocation6 + $0x700] sm:$0xff]  ;;  %366 = vmatpush.msra.mxu0 %v125_v29  ;;  %v194_v29 = vld [vmem:[#allocation6 + $0x328] sm:$0xff] }
  0x24   :  { %v189_v31 = vld [vmem:[#allocation6 + $0x300] sm:$0xff]  ;;  %426 = vmatpush.msra.mxu3 %v317_v30  ;;  %v250_v30 = vld [vmem:[#allocation6 + $0x4e8] sm:$0xff] }
  0x25   :  { %v249_v32 = vld [vmem:[#allocation6 + $0x4e0] sm:$0xff]  ;;  %386 = vmatpush.msra.mxu1 %v189_v31  ;;  %v318_v31 = vld [vmem:[#allocation6 + $0x708] sm:$0xff] }
  0x26   :  { %v121_v33 = vld [vmem:[#allocation6 + $0xe0] sm:$0xff]  ;;  %407 = vmatpush.msra.mxu2 %v249_v32  ;;  %v122_v32 = vld [vmem:[#allocation6 + $0xe8] sm:$0xff] }
  0x27   :  { %v313_v34 = vld [vmem:[#allocation6 + $0x6e0] sm:$0xff]  ;;  %367 = vmatpush.msra.mxu0 %v121_v33  ;;  %v190_v33 = vld [vmem:[#allocation6 + $0x308] sm:$0xff] }
  0x28   :  { %v185_v35 = vld [vmem:[#allocation6 + $0x2e0] sm:$0xff]  ;;  %427 = vmatpush.msra.mxu3 %v313_v34  ;;  %v246_v34 = vld [vmem:[#allocation6 + $0x4c8] sm:$0xff] }
  0x29   :  { %v245_v36 = vld [vmem:[#allocation6 + $0x4c0] sm:$0xff]  ;;  %387 = vmatpush.msra.mxu1 %v185_v35  ;;  %v314_v35 = vld [vmem:[#allocation6 + $0x6e8] sm:$0xff] }
  0x2a   :  { %v117_v37 = vld [vmem:[#allocation6 + $0xc0] sm:$0xff]  ;;  %408 = vmatpush.msra.mxu2 %v245_v36  ;;  %v118_v36 = vld [vmem:[#allocation6 + $0xc8] sm:$0xff] }
  0x2b   :  { %v309_v38 = vld [vmem:[#allocation6 + $0x6c0] sm:$0xff]  ;;  %368 = vmatpush.msra.mxu0 %v117_v37  ;;  %v186_v37 = vld [vmem:[#allocation6 + $0x2e8] sm:$0xff] }
  0x2c   :  { %v181_v39 = vld [vmem:[#allocation6 + $0x2c0] sm:$0xff]  ;;  %428 = vmatpush.msra.mxu3 %v309_v38  ;;  %v242_v38 = vld [vmem:[#allocation6 + $0x4a8] sm:$0xff] }
  0x2d   :  { %v241_v40 = vld [vmem:[#allocation6 + $0x4a0] sm:$0xff]  ;;  %388 = vmatpush.msra.mxu1 %v181_v39  ;;  %v310_v39 = vld [vmem:[#allocation6 + $0x6c8] sm:$0xff] }
  0x2e   :  { %v113_v41 = vld [vmem:[#allocation6 + $0xa0] sm:$0xff]  ;;  %409 = vmatpush.msra.mxu2 %v241_v40  ;;  %v114_v40 = vld [vmem:[#allocation6 + $0xa8] sm:$0xff] }
  0x2f   :  { %v305_v42 = vld [vmem:[#allocation6 + $0x6a0] sm:$0xff]  ;;  %369 = vmatpush.msra.mxu0 %v113_v41  ;;  %v182_v41 = vld [vmem:[#allocation6 + $0x2c8] sm:$0xff] }
  0x30   :  { %v177_v43 = vld [vmem:[#allocation6 + $0x2a0] sm:$0xff]  ;;  %429 = vmatpush.msra.mxu3 %v305_v42  ;;  %v238_v42 = vld [vmem:[#allocation6 + $0x488] sm:$0xff] }
  0x31   :  { %v237_v44 = vld [vmem:[#allocation6 + $0x480] sm:$0xff]  ;;  %389 = vmatpush.msra.mxu1 %v177_v43  ;;  %v306_v43 = vld [vmem:[#allocation6 + $0x6a8] sm:$0xff] }
  0x32   :  { %v109_v45 = vld [vmem:[#allocation6 + $0x80] sm:$0xff]  ;;  %410 = vmatpush.msra.mxu2 %v237_v44  ;;  %v110_v44 = vld [vmem:[#allocation6 + $0x88] sm:$0xff] }
  0x33   :  { %v301_v46 = vld [vmem:[#allocation6 + $0x680] sm:$0xff]  ;;  %370 = vmatpush.msra.mxu0 %v109_v45  ;;  %v178_v45 = vld [vmem:[#allocation6 + $0x2a8] sm:$0xff] }
  0x34   :  { %v173_v47 = vld [vmem:[#allocation6 + $0x280] sm:$0xff]  ;;  %430 = vmatpush.msra.mxu3 %v301_v46  ;;  %v234_v46 = vld [vmem:[#allocation6 + $0x468] sm:$0xff] }
  0x35   :  { %v233_v48 = vld [vmem:[#allocation6 + $0x460] sm:$0xff]  ;;  %390 = vmatpush.msra.mxu1 %v173_v47  ;;  %v302_v47 = vld [vmem:[#allocation6 + $0x688] sm:$0xff] }
  0x36   :  { %v105_v49 = vld [vmem:[#allocation6 + $0x60] sm:$0xff]  ;;  %411 = vmatpush.msra.mxu2 %v233_v48  ;;  %v106_v48 = vld [vmem:[#allocation6 + $0x68] sm:$0xff] }
  0x37   :  { %v297_v50 = vld [vmem:[#allocation6 + $0x660] sm:$0xff]  ;;  %371 = vmatpush.msra.mxu0 %v105_v49  ;;  %v174_v49 = vld [vmem:[#allocation6 + $0x288] sm:$0xff] }
  0x38   :  { %v169_v51 = vld [vmem:[#allocation6 + $0x260] sm:$0xff]  ;;  %431 = vmatpush.msra.mxu3 %v297_v50  ;;  %v230_v50 = vld [vmem:[#allocation6 + $0x448] sm:$0xff] }
  0x39   :  { %v229_v52 = vld [vmem:[#allocation6 + $0x440] sm:$0xff]  ;;  %391 = vmatpush.msra.mxu1 %v169_v51  ;;  %v298_v51 = vld [vmem:[#allocation6 + $0x668] sm:$0xff] }
  0x3a   :  { %v101_v53 = vld [vmem:[#allocation6 + $0x40] sm:$0xff]  ;;  %412 = vmatpush.msra.mxu2 %v229_v52  ;;  %v102_v52 = vld [vmem:[#allocation6 + $0x48] sm:$0xff] }
  0x3b   :  { %v293_v54 = vld [vmem:[#allocation6 + $0x640] sm:$0xff]  ;;  %372 = vmatpush.msra.mxu0 %v101_v53  ;;  %v170_v53 = vld [vmem:[#allocation6 + $0x268] sm:$0xff] }
  0x3c   :  { %v165_v55 = vld [vmem:[#allocation6 + $0x240] sm:$0xff]  ;;  %432 = vmatpush.msra.mxu3 %v293_v54  ;;  %v226_v54 = vld [vmem:[#allocation6 + $0x428] sm:$0xff] }
  0x3d   :  { %v225_v56 = vld [vmem:[#allocation6 + $0x420] sm:$0xff]  ;;  %392 = vmatpush.msra.mxu1 %v165_v55  ;;  %v294_v55 = vld [vmem:[#allocation6 + $0x648] sm:$0xff] }
  0x3e   :  { %v97_v57 = vld [vmem:[#allocation6 + $0x20] sm:$0xff]  ;;  %413 = vmatpush.msra.mxu2 %v225_v56  ;;  %v98_v56 = vld [vmem:[#allocation6 + $0x28] sm:$0xff] }
  0x3f   :  { %v289_v58 = vld [vmem:[#allocation6 + $0x620] sm:$0xff]  ;;  %373 = vmatpush.msra.mxu0 %v97_v57  ;;  %v166_v57 = vld [vmem:[#allocation6 + $0x248] sm:$0xff] }
  0x40   :  { %v161_v59 = vld [vmem:[#allocation6 + $0x220] sm:$0xff]  ;;  %433 = vmatpush.msra.mxu3 %v289_v58  ;;  %v222_v58 = vld [vmem:[#allocation6 + $0x408] sm:$0xff] }
  0x41   :  { %v221_v60 = vld [vmem:[#allocation6 + $0x400] sm:$0xff]  ;;  %393 = vmatpush.msra.mxu1 %v161_v59  ;;  %v290_v59 = vld [vmem:[#allocation6 + $0x628] sm:$0xff] }
  0x42   :  { %v93_v61 = vld [vmem:[#allocation6] sm:$0xff]  ;;  %414 = vmatpush.msra.mxu2 %v221_v60  ;;  %v1682_v60 = vld [vmem:[%s1867_s0 + $0x10] sm:$0xff] }
  0x43   :  { %v285_v63 = vld [vmem:[#allocation6 + $0x600] sm:$0xff]  ;;  %374 = vmatpush.msra.mxu0 %v93_v61  ;;  %v94_v61 = vld [vmem:[#allocation6 + $0x8] sm:$0xff]  ;;  %415 = vmatmul.f32.vlgmr.msra.gmra.mxu2 %v1682_v60 }
  0x44   :  { %v157_v3 = vld [vmem:[#allocation6 + $0x200] sm:$0xff]  ;;  %479 = vmatpush.msrb.mxu2 %v282_v62  ;;  %434 = vmatpush.msra.mxu3 %v285_v63  ;;  %v283_v62 = vld [vmem:[#allocation6 + $0x5f0] sm:$0xff]  ;;  %v162_v63 = vld [vmem:[#allocation6 + $0x228] sm:$0xff] }
  0x45   :  { %439 = vmatpush.msrb.mxu0 %v154_v0  ;;  %394 = vmatpush.msra.mxu1 %v157_v3  ;;  %v286_v0 = vld [vmem:[#allocation6 + $0x608] sm:$0xff]  ;;  %v155_v3 = vld [vmem:[#allocation6 + $0x1f0] sm:$0xff] }
  0x46   :  { %499 = vmatpush.msrb.mxu3 %v346_v1  ;;  %480 = vmatpush.msrb.mxu2 %v278_v2  ;;  %v1687_v1 = vld [vmem:[%s1867_s0] sm:$0xff]  ;;  %v1693_v2 = vld [vmem:[%s1867_s0 + $0x18] sm:$0xff] }
  0x47   :  { %440 = vmatpush.msrb.mxu0 %v150_v4  ;;  %459 = vmatpush.msrb.mxu1 %v218_v5  ;;  %v279_v4 = vld [vmem:[#allocation6 + $0x5d0] sm:$0xff] }
  0x48   :  { %481 = vmatpush.msrb.mxu2 %v274_v6  ;;  %500 = vmatpush.msrb.mxu3 %v342_v7  ;;  %v347_v5 = vld [vmem:[#allocation6 + $0x7f0] sm:$0xff]  ;;  %v158_v6 = vld [vmem:[#allocation6 + $0x208] sm:$0xff] }
  0x49   :  { %441 = vmatpush.msrb.mxu0 %v146_v8  ;;  %460 = vmatpush.msrb.mxu1 %v214_v9  ;;  %v151_v7 = vld [vmem:[#allocation6 + $0x1d0] sm:$0xff]  ;;  %v1700_v8 = vld [vmem:[%s1867_s0 + $0x8] sm:$0xff] }
  0x4a   :  { %482 = vmatpush.msrb.mxu2 %v270_v10  ;;  %501 = vmatpush.msrb.mxu3 %v338_v11  ;;  %v275_v9 = vld [vmem:[#allocation6 + $0x5b0] sm:$0xff] }
  0x4b   :  { %442 = vmatpush.msrb.mxu0 %v142_v12  ;;  %461 = vmatpush.msrb.mxu1 %v210_v13  ;;  %v219_v10 = vld [vmem:[#allocation6 + $0x3f0] sm:$0xff] }
  0x4c   :  { %483 = vmatpush.msrb.mxu2 %v266_v14  ;;  %502 = vmatpush.msrb.mxu3 %v334_v15  ;;  %v343_v11 = vld [vmem:[#allocation6 + $0x7d0] sm:$0xff] }
  0x4d   :  { %443 = vmatpush.msrb.mxu0 %v138_v16  ;;  %462 = vmatpush.msrb.mxu1 %v206_v17  ;;  %v147_v12 = vld [vmem:[#allocation6 + $0x1b0] sm:$0xff] }
  0x4e   :  { %484 = vmatpush.msrb.mxu2 %v262_v18  ;;  %503 = vmatpush.msrb.mxu3 %v330_v19  ;;  %v271_v13 = vld [vmem:[#allocation6 + $0x590] sm:$0xff] }
  0x4f   :  { %444 = vmatpush.msrb.mxu0 %v134_v20  ;;  %463 = vmatpush.msrb.mxu1 %v202_v21  ;;  %v215_v14 = vld [vmem:[#allocation6 + $0x3d0] sm:$0xff] }
  0x50   :  { %485 = vmatpush.msrb.mxu2 %v258_v22  ;;  %504 = vmatpush.msrb.mxu3 %v326_v23  ;;  %v339_v15 = vld [vmem:[#allocation6 + $0x7b0] sm:$0xff] }
  0x51   :  { %445 = vmatpush.msrb.mxu0 %v130_v24  ;;  %464 = vmatpush.msrb.mxu1 %v198_v25  ;;  %v143_v16 = vld [vmem:[#allocation6 + $0x190] sm:$0xff] }
  0x52   :  { %486 = vmatpush.msrb.mxu2 %v254_v26  ;;  %505 = vmatpush.msrb.mxu3 %v322_v27  ;;  %v267_v17 = vld [vmem:[#allocation6 + $0x570] sm:$0xff] }
  0x53   :  { %446 = vmatpush.msrb.mxu0 %v126_v28  ;;  %465 = vmatpush.msrb.mxu1 %v194_v29  ;;  %v211_v18 = vld [vmem:[#allocation6 + $0x3b0] sm:$0xff] }
  0x54   :  { %487 = vmatpush.msrb.mxu2 %v250_v30  ;;  %506 = vmatpush.msrb.mxu3 %v318_v31  ;;  %v335_v19 = vld [vmem:[#allocation6 + $0x790] sm:$0xff] }
  0x55   :  { %447 = vmatpush.msrb.mxu0 %v122_v32  ;;  %466 = vmatpush.msrb.mxu1 %v190_v33  ;;  %v139_v20 = vld [vmem:[#allocation6 + $0x170] sm:$0xff] }
  0x56   :  { %488 = vmatpush.msrb.mxu2 %v246_v34  ;;  %507 = vmatpush.msrb.mxu3 %v314_v35  ;;  %v263_v21 = vld [vmem:[#allocation6 + $0x550] sm:$0xff] }
  0x57   :  { %448 = vmatpush.msrb.mxu0 %v118_v36  ;;  %467 = vmatpush.msrb.mxu1 %v186_v37  ;;  %v207_v22 = vld [vmem:[#allocation6 + $0x390] sm:$0xff] }
  0x58   :  { %489 = vmatpush.msrb.mxu2 %v242_v38  ;;  %508 = vmatpush.msrb.mxu3 %v310_v39  ;;  %v331_v23 = vld [vmem:[#allocation6 + $0x770] sm:$0xff] }
  0x59   :  { %449 = vmatpush.msrb.mxu0 %v114_v40  ;;  %468 = vmatpush.msrb.mxu1 %v182_v41  ;;  %v135_v24 = vld [vmem:[#allocation6 + $0x150] sm:$0xff] }
  0x5a   :  { %490 = vmatpush.msrb.mxu2 %v238_v42  ;;  %509 = vmatpush.msrb.mxu3 %v306_v43  ;;  %v259_v25 = vld [vmem:[#allocation6 + $0x530] sm:$0xff] }
  0x5b   :  { %450 = vmatpush.msrb.mxu0 %v110_v44  ;;  %469 = vmatpush.msrb.mxu1 %v178_v45  ;;  %v203_v26 = vld [vmem:[#allocation6 + $0x370] sm:$0xff] }
  0x5c   :  { %491 = vmatpush.msrb.mxu2 %v234_v46  ;;  %510 = vmatpush.msrb.mxu3 %v302_v47  ;;  %v327_v27 = vld [vmem:[#allocation6 + $0x750] sm:$0xff] }
  0x5d   :  { %451 = vmatpush.msrb.mxu0 %v106_v48  ;;  %470 = vmatpush.msrb.mxu1 %v174_v49  ;;  %v131_v28 = vld [vmem:[#allocation6 + $0x130] sm:$0xff] }
  0x5e   :  { %492 = vmatpush.msrb.mxu2 %v230_v50  ;;  %511 = vmatpush.msrb.mxu3 %v298_v51  ;;  %v255_v29 = vld [vmem:[#allocation6 + $0x510] sm:$0xff] }
  0x5f   :  { %452 = vmatpush.msrb.mxu0 %v102_v52  ;;  %471 = vmatpush.msrb.mxu1 %v170_v53  ;;  %v199_v30 = vld [vmem:[#allocation6 + $0x350] sm:$0xff] }
  0x60   :  { %493 = vmatpush.msrb.mxu2 %v226_v54  ;;  %512 = vmatpush.msrb.mxu3 %v294_v55  ;;  %v323_v31 = vld [vmem:[#allocation6 + $0x730] sm:$0xff] }
  0x61   :  { %453 = vmatpush.msrb.mxu0 %v98_v56  ;;  %472 = vmatpush.msrb.mxu1 %v166_v57  ;;  %v127_v32 = vld [vmem:[#allocation6 + $0x110] sm:$0xff] }
  0x62   :  { %494 = vmatpush.msrb.mxu2 %v222_v58  ;;  %513 = vmatpush.msrb.mxu3 %v290_v59  ;;  %v251_v33 = vld [vmem:[#allocation6 + $0x4f0] sm:$0xff] }
  0x63   :  { %454 = vmatpush.msrb.mxu0 %v94_v61  ;;  %473 = vmatpush.msrb.mxu1 %v162_v63  ;;  %v195_v34 = vld [vmem:[#allocation6 + $0x330] sm:$0xff] }
  0x64   :  { %559 = vmatpush.msra.mxu2 %v283_v62  ;;  %514 = vmatpush.msrb.mxu3 %v286_v0  ;;  %v319_v35 = vld [vmem:[#allocation6 + $0x710] sm:$0xff] }
  0x65   :  { %375 = vmatmul.f32.vlgmr.msra.gmra.mxu0 %v1687_v1  ;;  %435 = vmatmul.f32.vlgmr.msra.gmra.mxu3 %v1693_v2  ;;  %v123_v36 = vld [vmem:[#allocation6 + $0xf0] sm:$0xff] }
  0x66   :  { %519 = vmatpush.msra.mxu0 %v155_v3  ;;  %560 = vmatpush.msra.mxu2 %v279_v4  ;;  %v247_v37 = vld [vmem:[#allocation6 + $0x4d0] sm:$0xff]  ;;  %v284_v4 = vld [vmem:[#allocation6 + $0x5f8] sm:$0xff] }
  0x67   :  { %579 = vmatpush.msra.mxu3 %v347_v5  ;;  %474 = vmatpush.msrb.mxu1 %v158_v6  ;;  %v191_v38 = vld [vmem:[#allocation6 + $0x310] sm:$0xff] }
  0x68   :  { %520 = vmatpush.msra.mxu0 %v151_v7  ;;  %395 = vmatmul.f32.vlgmr.msra.gmra.mxu1 %v1700_v8  ;;  %v315_v39 = vld [vmem:[#allocation6 + $0x6f0] sm:$0xff]  ;;  %v156_v7 = vld [vmem:[#allocation6 + $0x1f8] sm:$0xff] }
  0x69   :  { %561 = vmatpush.msra.mxu2 %v275_v9  ;;  %539 = vmatpush.msra.mxu1 %v219_v10  ;;  %v119_v40 = vld [vmem:[#allocation6 + $0xd0] sm:$0xff]  ;;  %v280_v9 = vld [vmem:[#allocation6 + $0x5d8] sm:$0xff] }
  0x6a   :  { %580 = vmatpush.msra.mxu3 %v343_v11  ;;  %521 = vmatpush.msra.mxu0 %v147_v12  ;;  %v243_v41 = vld [vmem:[#allocation6 + $0x4b0] sm:$0xff]  ;;  %v348_v10 = vld [vmem:[#allocation6 + $0x7f8] sm:$0xff] }
  0x6b   :  { %562 = vmatpush.msra.mxu2 %v271_v13  ;;  %540 = vmatpush.msra.mxu1 %v215_v14  ;;  %v187_v42 = vld [vmem:[#allocation6 + $0x2f0] sm:$0xff]  ;;  %v152_v12 = vld [vmem:[#allocation6 + $0x1d8] sm:$0xff] }
  0x6c   :  { %581 = vmatpush.msra.mxu3 %v339_v15  ;;  %522 = vmatpush.msra.mxu0 %v143_v16  ;;  %v311_v43 = vld [vmem:[#allocation6 + $0x6d0] sm:$0xff]  ;;  %v276_v13 = vld [vmem:[#allocation6 + $0x5b8] sm:$0xff] }
  0x6d   :  { %563 = vmatpush.msra.mxu2 %v267_v17  ;;  %541 = vmatpush.msra.mxu1 %v211_v18  ;;  %v115_v44 = vld [vmem:[#allocation6 + $0xb0] sm:$0xff]  ;;  %v220_v14 = vld [vmem:[#allocation6 + $0x3f8] sm:$0xff] }
  0x6e   :  { %582 = vmatpush.msra.mxu3 %v335_v19  ;;  %523 = vmatpush.msra.mxu0 %v139_v20  ;;  %v239_v45 = vld [vmem:[#allocation6 + $0x490] sm:$0xff]  ;;  %v344_v15 = vld [vmem:[#allocation6 + $0x7d8] sm:$0xff] }
  0x6f   :  { %564 = vmatpush.msra.mxu2 %v263_v21  ;;  %542 = vmatpush.msra.mxu1 %v207_v22  ;;  %v183_v46 = vld [vmem:[#allocation6 + $0x2d0] sm:$0xff]  ;;  %v148_v16 = vld [vmem:[#allocation6 + $0x1b8] sm:$0xff] }
  0x70   :  { %583 = vmatpush.msra.mxu3 %v331_v23  ;;  %524 = vmatpush.msra.mxu0 %v135_v24  ;;  %v307_v47 = vld [vmem:[#allocation6 + $0x6b0] sm:$0xff]  ;;  %v272_v17 = vld [vmem:[#allocation6 + $0x598] sm:$0xff] }
  0x71   :  { %565 = vmatpush.msra.mxu2 %v259_v25  ;;  %543 = vmatpush.msra.mxu1 %v203_v26  ;;  %v111_v48 = vld [vmem:[#allocation6 + $0x90] sm:$0xff]  ;;  %v216_v18 = vld [vmem:[#allocation6 + $0x3d8] sm:$0xff] }
  0x72   :  { %584 = vmatpush.msra.mxu3 %v327_v27  ;;  %525 = vmatpush.msra.mxu0 %v131_v28  ;;  %v235_v49 = vld [vmem:[#allocation6 + $0x470] sm:$0xff]  ;;  %v340_v19 = vld [vmem:[#allocation6 + $0x7b8] sm:$0xff] }
  0x73   :  { %566 = vmatpush.msra.mxu2 %v255_v29  ;;  %544 = vmatpush.msra.mxu1 %v199_v30  ;;  %v179_v50 = vld [vmem:[#allocation6 + $0x2b0] sm:$0xff]  ;;  %v144_v20 = vld [vmem:[#allocation6 + $0x198] sm:$0xff] }
  0x74   :  { %585 = vmatpush.msra.mxu3 %v323_v31  ;;  %526 = vmatpush.msra.mxu0 %v127_v32  ;;  %v303_v51 = vld [vmem:[#allocation6 + $0x690] sm:$0xff]  ;;  %v268_v21 = vld [vmem:[#allocation6 + $0x578] sm:$0xff] }
  0x75   :  { %567 = vmatpush.msra.mxu2 %v251_v33  ;;  %545 = vmatpush.msra.mxu1 %v195_v34  ;;  %v107_v52 = vld [vmem:[#allocation6 + $0x70] sm:$0xff]  ;;  %v212_v22 = vld [vmem:[#allocation6 + $0x3b8] sm:$0xff] }
  0x76   :  { %586 = vmatpush.msra.mxu3 %v319_v35  ;;  %527 = vmatpush.msra.mxu0 %v123_v36  ;;  %v231_v53 = vld [vmem:[#allocation6 + $0x450] sm:$0xff]  ;;  %v336_v23 = vld [vmem:[#allocation6 + $0x798] sm:$0xff] }
  0x77   :  { %568 = vmatpush.msra.mxu2 %v247_v37  ;;  %546 = vmatpush.msra.mxu1 %v191_v38  ;;  %v175_v54 = vld [vmem:[#allocation6 + $0x290] sm:$0xff]  ;;  %v140_v24 = vld [vmem:[#allocation6 + $0x178] sm:$0xff] }
  0x78   :  { %587 = vmatpush.msra.mxu3 %v315_v39  ;;  %528 = vmatpush.msra.mxu0 %v119_v40  ;;  %v299_v55 = vld [vmem:[#allocation6 + $0x670] sm:$0xff]  ;;  %v264_v25 = vld [vmem:[#allocation6 + $0x558] sm:$0xff] }
  0x79   :  { %569 = vmatpush.msra.mxu2 %v243_v41  ;;  %547 = vmatpush.msra.mxu1 %v187_v42  ;;  %v103_v56 = vld [vmem:[#allocation6 + $0x50] sm:$0xff]  ;;  %v208_v26 = vld [vmem:[#allocation6 + $0x398] sm:$0xff] }
  0x7a   :  { %588 = vmatpush.msra.mxu3 %v311_v43  ;;  %529 = vmatpush.msra.mxu0 %v115_v44  ;;  %v227_v57 = vld [vmem:[#allocation6 + $0x430] sm:$0xff]  ;;  %v332_v27 = vld [vmem:[#allocation6 + $0x778] sm:$0xff] }
  0x7b   :  { %570 = vmatpush.msra.mxu2 %v239_v45  ;;  %548 = vmatpush.msra.mxu1 %v183_v46  ;;  %v171_v58 = vld [vmem:[#allocation6 + $0x270] sm:$0xff]  ;;  %v136_v28 = vld [vmem:[#allocation6 + $0x158] sm:$0xff] }
  0x7c   :  { %589 = vmatpush.msra.mxu3 %v307_v47  ;;  %530 = vmatpush.msra.mxu0 %v111_v48  ;;  %v295_v59 = vld [vmem:[#allocation6 + $0x650] sm:$0xff]  ;;  %v260_v29 = vld [vmem:[#allocation6 + $0x538] sm:$0xff] }
  0x7d   :  { %571 = vmatpush.msra.mxu2 %v235_v49  ;;  %549 = vmatpush.msra.mxu1 %v179_v50  ;;  %v99_v61 = vld [vmem:[#allocation6 + $0x30] sm:$0xff]  ;;  %v204_v30 = vld [vmem:[#allocation6 + $0x378] sm:$0xff] }
  0x7e   :  { %590 = vmatpush.msra.mxu3 %v303_v51  ;;  %531 = vmatpush.msra.mxu0 %v107_v52  ;;  %v223_v62 = vld [vmem:[#allocation6 + $0x410] sm:$0xff]  ;;  %v328_v31 = vld [vmem:[#allocation6 + $0x758] sm:$0xff] }
  0x7f   :  { %572 = vmatpush.msra.mxu2 %v231_v53  ;;  %550 = vmatpush.msra.mxu1 %v175_v54  ;;  %v167_v63 = vld [vmem:[#allocation6 + $0x250] sm:$0xff]  ;;  %v132_v32 = vld [vmem:[#allocation6 + $0x138] sm:$0xff] }
  0x80   :  { %591 = vmatpush.msra.mxu3 %v299_v55  ;;  %532 = vmatpush.msra.mxu0 %v103_v56  ;;  %v291_v0 = vld [vmem:[#allocation6 + $0x630] sm:$0xff]  ;;  %v256_v33 = vld [vmem:[#allocation6 + $0x518] sm:$0xff] }
  0x81   :  { %573 = vmatpush.msra.mxu2 %v227_v57  ;;  %551 = vmatpush.msra.mxu1 %v171_v58  ;;  %v95_v3 = vld [vmem:[#allocation6 + $0x10] sm:$0xff]  ;;  %v200_v34 = vld [vmem:[#allocation6 + $0x358] sm:$0xff] }
  0x82   :  { %592 = vmatpush.msra.mxu3 %v295_v59  ;;  %533 = vmatpush.msra.mxu0 %v99_v61  ;;  %v163_v5 = vld [vmem:[#allocation6 + $0x230] sm:$0xff]  ;;  %v324_v35 = vld [vmem:[#allocation6 + $0x738] sm:$0xff] }
  0x83   :  { %574 = vmatpush.msra.mxu2 %v223_v62  ;;  %552 = vmatpush.msra.mxu1 %v167_v63  ;;  %v287_v6 = vld [vmem:[#allocation6 + $0x610] sm:$0xff]  ;;  %v128_v36 = vld [vmem:[#allocation6 + $0x118] sm:$0xff] }
  0x84   :  { %593 = vmatpush.msra.mxu3 %v291_v0  ;;  %495 = vmatmul.f32.vlgmr.msrb.gmra.mxu2 %v1682_v60  ;;  %v159_v11 = vld [vmem:[#allocation6 + $0x210] sm:$0xff]  ;;  %v252_v37 = vld [vmem:[#allocation6 + $0x4f8] sm:$0xff] }
  0x85   :  { %534 = vmatpush.msra.mxu0 %v95_v3  ;;  %639 = vmatpush.msrb.mxu2 %v284_v4  ;;  %v196_v38 = vld [vmem:[#allocation6 + $0x338] sm:$0xff] }
  0x86   :  { %553 = vmatpush.msra.mxu1 %v163_v5  ;;  %594 = vmatpush.msra.mxu3 %v287_v6  ;;  %v320_v39 = vld [vmem:[#allocation6 + $0x718] sm:$0xff] }
  0x87   :  { %455 = vmatmul.f32.vlgmr.msrb.gmra.mxu0 %v1687_v1  ;;  %515 = vmatmul.f32.vlgmr.msrb.gmra.mxu3 %v1693_v2  ;;  %v124_v40 = vld [vmem:[#allocation6 + $0xf8] sm:$0xff] }
  0x88   :  { %599 = vmatpush.msrb.mxu0 %v156_v7  ;;  %640 = vmatpush.msrb.mxu2 %v280_v9  ;;  %v248_v41 = vld [vmem:[#allocation6 + $0x4d8] sm:$0xff] }
  0x89   :  { %659 = vmatpush.msrb.mxu3 %v348_v10  ;;  %554 = vmatpush.msra.mxu1 %v159_v11  ;;  %v192_v42 = vld [vmem:[#allocation6 + $0x318] sm:$0xff] }
  0x8a   :  { %600 = vmatpush.msrb.mxu0 %v152_v12  ;;  %475 = vmatmul.f32.vlgmr.msrb.gmra.mxu1 %v1700_v8  ;;  %v316_v43 = vld [vmem:[#allocation6 + $0x6f8] sm:$0xff] }
  0x8b   :  { %641 = vmatpush.msrb.mxu2 %v276_v13  ;;  %619 = vmatpush.msrb.mxu1 %v220_v14  ;;  %v120_v44 = vld [vmem:[#allocation6 + $0xd8] sm:$0xff] }
  0x8c   :  { %660 = vmatpush.msrb.mxu3 %v344_v15  ;;  %601 = vmatpush.msrb.mxu0 %v148_v16  ;;  %v244_v45 = vld [vmem:[#allocation6 + $0x4b8] sm:$0xff] }
  0x8d   :  { %642 = vmatpush.msrb.mxu2 %v272_v17  ;;  %620 = vmatpush.msrb.mxu1 %v216_v18  ;;  %v188_v46 = vld [vmem:[#allocation6 + $0x2f8] sm:$0xff] }
  0x8e   :  { %661 = vmatpush.msrb.mxu3 %v340_v19  ;;  %602 = vmatpush.msrb.mxu0 %v144_v20  ;;  %v312_v47 = vld [vmem:[#allocation6 + $0x6d8] sm:$0xff] }
  0x8f   :  { %643 = vmatpush.msrb.mxu2 %v268_v21  ;;  %621 = vmatpush.msrb.mxu1 %v212_v22  ;;  %v116_v48 = vld [vmem:[#allocation6 + $0xb8] sm:$0xff] }
  0x90   :  { %662 = vmatpush.msrb.mxu3 %v336_v23  ;;  %603 = vmatpush.msrb.mxu0 %v140_v24  ;;  %v240_v49 = vld [vmem:[#allocation6 + $0x498] sm:$0xff] }
  0x91   :  { %644 = vmatpush.msrb.mxu2 %v264_v25  ;;  %622 = vmatpush.msrb.mxu1 %v208_v26  ;;  %v184_v50 = vld [vmem:[#allocation6 + $0x2d8] sm:$0xff] }
  0x92   :  { %663 = vmatpush.msrb.mxu3 %v332_v27  ;;  %604 = vmatpush.msrb.mxu0 %v136_v28  ;;  %v308_v51 = vld [vmem:[#allocation6 + $0x6b8] sm:$0xff] }
  0x93   :  { %645 = vmatpush.msrb.mxu2 %v260_v29  ;;  %623 = vmatpush.msrb.mxu1 %v204_v30  ;;  %v112_v52 = vld [vmem:[#allocation6 + $0x98] sm:$0xff] }
  0x94   :  { %664 = vmatpush.msrb.mxu3 %v328_v31  ;;  %605 = vmatpush.msrb.mxu0 %v132_v32  ;;  %v180_v53 = vld [vmem:[#allocation6 + $0x2b8] sm:$0xff] }
  0x95   :  { %646 = vmatpush.msrb.mxu2 %v256_v33  ;;  %624 = vmatpush.msrb.mxu1 %v200_v34  ;;  %v236_v54 = vld [vmem:[#allocation6 + $0x478] sm:$0xff] }
  0x96   :  { %665 = vmatpush.msrb.mxu3 %v324_v35  ;;  %606 = vmatpush.msrb.mxu0 %v128_v36  ;;  %v304_v55 = vld [vmem:[#allocation6 + $0x698] sm:$0xff] }
  0x97   :  { %647 = vmatpush.msrb.mxu2 %v252_v37  ;;  %625 = vmatpush.msrb.mxu1 %v196_v38  ;;  %v108_v56 = vld [vmem:[#allocation6 + $0x78] sm:$0xff] }
  0x98   :  { %666 = vmatpush.msrb.mxu3 %v320_v39  ;;  %607 = vmatpush.msrb.mxu0 %v124_v40  ;;  %v176_v57 = vld [vmem:[#allocation6 + $0x298] sm:$0xff] }
  0x99   :  { %648 = vmatpush.msrb.mxu2 %v248_v41  ;;  %626 = vmatpush.msrb.mxu1 %v192_v42  ;;  %v232_v58 = vld [vmem:[#allocation6 + $0x458] sm:$0xff] }
  0x9a   :  { %667 = vmatpush.msrb.mxu3 %v316_v43  ;;  %608 = vmatpush.msrb.mxu0 %v120_v44  ;;  %v300_v59 = vld [vmem:[#allocation6 + $0x678] sm:$0xff] }
  0x9b   :  { %649 = vmatpush.msrb.mxu2 %v244_v45  ;;  %627 = vmatpush.msrb.mxu1 %v188_v46  ;;  %v104_v61 = vld [vmem:[#allocation6 + $0x58] sm:$0xff] }
  0x9c   :  { %668 = vmatpush.msrb.mxu3 %v312_v47  ;;  %609 = vmatpush.msrb.mxu0 %v116_v48  ;;  %v172_v62 = vld [vmem:[#allocation6 + $0x278] sm:$0xff] }
  0x9d   :  { %650 = vmatpush.msrb.mxu2 %v240_v49  ;;  %628 = vmatpush.msrb.mxu1 %v184_v50  ;;  %v228_v63 = vld [vmem:[#allocation6 + $0x438] sm:$0xff] }
  0x9e   :  { %669 = vmatpush.msrb.mxu3 %v308_v51  ;;  %575 = vmatmul.f32.vlgmr.msra.gmra.mxu2 %v1682_v60  ;;  %v296_v0 = vld [vmem:[#allocation6 + $0x658] sm:$0xff] }
  0x9f   :  { %610 = vmatpush.msrb.mxu0 %v112_v52  ;;  %629 = vmatpush.msrb.mxu1 %v180_v53  ;;  %v100_v3 = vld [vmem:[#allocation6 + $0x38] sm:$0xff] }
  0xa0   :  { %651 = vmatpush.msrb.mxu2 %v236_v54  ;;  %670 = vmatpush.msrb.mxu3 %v304_v55  ;;  %v168_v4 = vld [vmem:[#allocation6 + $0x258] sm:$0xff] }
  0xa1   :  { %535 = vmatmul.f32.vlgmr.msra.gmra.mxu0 %v1687_v1  ;;  %595 = vmatmul.f32.vlgmr.msra.gmra.mxu3 %v1693_v2  ;;  %v224_v5 = vld [vmem:[#allocation6 + $0x418] sm:$0xff] }
  0xa2   :  { %611 = vmatpush.msrb.mxu0 %v108_v56  ;;  %630 = vmatpush.msrb.mxu1 %v176_v57  ;;  %v292_v6 = vld [vmem:[#allocation6 + $0x638] sm:$0xff] }
  0xa3   :  { %652 = vmatpush.msrb.mxu2 %v232_v58  ;;  %671 = vmatpush.msrb.mxu3 %v300_v59  ;;  %v96_v7 = vld [vmem:[#allocation6 + $0x18] sm:$0xff] }
  0xa4   :  { %555 = vmatmul.f32.vlgmr.msra.gmra.mxu1 %v1700_v8  ;;  %612 = vmatpush.msrb.mxu0 %v104_v61  ;;  %v164_v9 = vld [vmem:[#allocation6 + $0x238] sm:$0xff] }
  0xa5   :  { %631 = vmatpush.msrb.mxu1 %v172_v62  ;;  %653 = vmatpush.msrb.mxu2 %v228_v63  ;;  %v288_v10 = vld [vmem:[#allocation6 + $0x618] sm:$0xff] }
  0xa6   :  { %672 = vmatpush.msrb.mxu3 %v296_v0  ;;  %613 = vmatpush.msrb.mxu0 %v100_v3  ;;  %v160_v11 = vld [vmem:[#allocation6 + $0x218] sm:$0xff] }
  0xa7   :  { %632 = vmatpush.msrb.mxu1 %v168_v4  ;;  %654 = vmatpush.msrb.mxu2 %v224_v5 }
  0xa8   :  { %673 = vmatpush.msrb.mxu3 %v292_v6  ;;  %655 = vmatmul.f32.vlgmr.msrb.gmra.mxu2 %v1682_v60  ;;  %v349_v60 = vld [vmem:[%s1869_s2] sm:$0xf] }
  0xa9   :  { %614 = vmatpush.msrb.mxu0 %v96_v7  ;;  %633 = vmatpush.msrb.mxu1 %v164_v9  ;;  %v352_v19 = vperm.slane %v349_v60, 1  ;;  %v353_v29 = vperm.slane %v349_v60, 2  ;;  %v354_v37 = vperm.slane %v349_v60, 3 }
  0xaa   :  { %674 = vmatpush.msrb.mxu3 %v288_v10  ;;  %615 = vmatmul.f32.vlgmr.msrb.gmra.mxu0 %v1687_v1  ;;  %v351_v1 = vperm.slane %v349_v60, 0 }
  0xab   :  { %675 = vmatmul.f32.vlgmr.msrb.gmra.mxu3 %v1693_v2  ;;  %634 = vmatpush.msrb.mxu1 %v160_v11 }
  0xac   :  { %635 = vmatmul.f32.vlgmr.msrb.gmra.mxu1 %v1700_v8 }
  0xc6   :  { %v416_v13 = vpop.f32.mrf.mxu2 }
  0xe2   :  { %v376_v2 = vpop.f32.mrf.mxu0 }
  0xe3   :  { %v377_v8 = vadd.f32 %v376_v2, %v351_v1 }
  0xe5   :  { %v396_v12 = vpop.f32.mrf.mxu1 }
  0xe6   :  { %v397_v14 = vadd.f32 %v396_v12, %v377_v8 }
  0xe8   :  { %v417_v15 = vadd.f32 %v416_v13, %v397_v14  ;;  %v436_v16 = vpop.f32.mrf.mxu3 }
  0xea   :  { %v1727_v17 = vadd.f32 %v436_v16, %v417_v15 }
  0xec   :  { %v679_v18 = vmax.f32 %v1727_v17, 0.0 }
 0x104   :  { %v456_v20 = vpop.f32.mrf.mxu0 }
 0x105   :  { %v457_v21 = vadd.f32 %v456_v20, %v352_v19 }
 0x107   :  { %v476_v22 = vpop.f32.mrf.mxu1  ;;  %v496_v23 = vpop.f32.mrf.mxu2 }
 0x108   :  { %v477_v24 = vadd.f32 %v476_v22, %v457_v21 }
 0x10a   :  { %v497_v25 = vadd.f32 %v496_v23, %v477_v24  ;;  %v516_v26 = vpop.f32.mrf.mxu3 }
 0x10c   :  { %v1730_v27 = vadd.f32 %v516_v26, %v497_v25 }
 0x10e   :  { %v680_v28 = vmax.f32 %v1730_v27, 0.0 }
 0x11e   :  { %v536_v30 = vpop.f32.mrf.mxu0 }
 0x11f   :  { %v537_v31 = vadd.f32 %v536_v30, %v353_v29 }
 0x121   :  { %v556_v32 = vpop.f32.mrf.mxu1  ;;  %v576_v34 = vpop.f32.mrf.mxu2 }
 0x122   :  { %v557_v33 = vadd.f32 %v556_v32, %v537_v31 }
 0x124   :  { %v577_v35 = vadd.f32 %v576_v34, %v557_v33  ;;  %v596_v36 = vpop.f32.mrf.mxu3 }
 0x126   :  { %v1733_v38 = vadd.f32 %v596_v36, %v577_v35 }
 0x127   :  { %v616_v40 = vpop.f32.mrf.mxu0 }
 0x128   :  { %v681_v39 = vmax.f32 %v1733_v38, 0.0  ;;  %v617_v41 = vadd.f32 %v616_v40, %v354_v37 }
 0x129   :  { %v636_v42 = vpop.f32.mrf.mxu1 }
 0x12a   :  { %v637_v43 = vadd.f32 %v636_v42, %v617_v41 }
 0x12b   :  { %v656_v44 = vpop.f32.mrf.mxu2 }
 0x12c   :  { %v657_v45 = vadd.f32 %v656_v44, %v637_v43 }
 0x12e   :  { %v676_v46 = vpop.f32.mrf.mxu3 }
 0x12f   :  { %v1736_v47 = vadd.f32 %v676_v46, %v657_v45 }
 0x131   :  { %v682_v48 = vmax.f32 %v1736_v47, 0.0 }
 0x132   :  { %1600 = dma.done.wait [#allocation5], 16384 }
 0x133   :  { %1601 = vsyncadd [#allocation5], 4294950912  ;;  %v781_v49 = vld [vmem:[#allocation2 + $0x2f0] sm:$0xff]  ;;  %v779_v51 = vld [vmem:[#allocation2 + $0x2e0] sm:$0xff] }
 0x134   :  { %v717_v50 = vld [vmem:[#allocation2 + $0xf0] sm:$0xff]  ;;  %861 = vmatpush.msra.mxu2 %v781_v49  ;;  %v715_v53 = vld [vmem:[#allocation2 + $0xe0] sm:$0xff] }
 0x135   :  { %821 = vmatpush.msra.mxu0 %v717_v50  ;;  %v813_v52 = vld [vmem:[#allocation2 + $0x3f0] sm:$0xff]  ;;  %v811_v56 = vld [vmem:[#allocation2 + $0x3e0] sm:$0xff] }
 0x136   :  { %v749_v54 = vld [vmem:[#allocation2 + $0x1f0] sm:$0xff]  ;;  %881 = vmatpush.msra.mxu3 %v813_v52  ;;  %862 = vmatpush.msra.mxu2 %v779_v51  ;;  %v747_v58 = vld [vmem:[#allocation2 + $0x1e0] sm:$0xff] }
 0x137   :  { %841 = vmatpush.msra.mxu1 %v749_v54  ;;  %v777_v55 = vld [vmem:[#allocation2 + $0x2d0] sm:$0xff]  ;;  %822 = vmatpush.msra.mxu0 %v715_v53  ;;  %v775_v61 = vld [vmem:[#allocation2 + $0x2c0] sm:$0xff] }
 0x138   :  { %v713_v57 = vld [vmem:[#allocation2 + $0xd0] sm:$0xff]  ;;  %882 = vmatpush.msra.mxu3 %v811_v56  ;;  %v711_v62 = vld [vmem:[#allocation2 + $0xc0] sm:$0xff]  ;;  %863 = vmatpush.msra.mxu2 %v777_v55  ;;  %v782_v55 = vld [vmem:[#allocation2 + $0x2f8] sm:$0xff] }
 0x139   :  { %v809_v59 = vld [vmem:[#allocation2 + $0x3d0] sm:$0xff]  ;;  %842 = vmatpush.msra.mxu1 %v747_v58  ;;  %823 = vmatpush.msra.mxu0 %v713_v57  ;;  %v807_v0 = vld [vmem:[#allocation2 + $0x3c0] sm:$0xff]  ;;  %v718_v57 = vld [vmem:[#allocation2 + $0xf8] sm:$0xff] }
 0x13a   :  { %v745_v63 = vld [vmem:[#allocation2 + $0x1d0] sm:$0xff]  ;;  %v743_v3 = vld [vmem:[#allocation2 + $0x1c0] sm:$0xff]  ;;  %883 = vmatpush.msra.mxu3 %v809_v59  ;;  %864 = vmatpush.msra.mxu2 %v775_v61  ;;  %v814_v58 = vld [vmem:[#allocation2 + $0x3f8] sm:$0xff] }
 0x13b   :  { %843 = vmatpush.msra.mxu1 %v745_v63  ;;  %v773_v4 = vld [vmem:[#allocation2 + $0x2b0] sm:$0xff]  ;;  %824 = vmatpush.msra.mxu0 %v711_v62  ;;  %v771_v9 = vld [vmem:[#allocation2 + $0x2a0] sm:$0xff]  ;;  %v780_v59 = vld [vmem:[#allocation2 + $0x2e8] sm:$0xff] }
 0x13c   :  { %v709_v5 = vld [vmem:[#allocation2 + $0xb0] sm:$0xff]  ;;  %884 = vmatpush.msra.mxu3 %v807_v0  ;;  %v707_v10 = vld [vmem:[#allocation2 + $0xa0] sm:$0xff]  ;;  %865 = vmatpush.msra.mxu2 %v773_v4  ;;  %v716_v62 = vld [vmem:[#allocation2 + $0xe8] sm:$0xff] }
 0x13d   :  { %v805_v6 = vld [vmem:[#allocation2 + $0x3b0] sm:$0xff]  ;;  %844 = vmatpush.msra.mxu1 %v743_v3  ;;  %825 = vmatpush.msra.mxu0 %v709_v5  ;;  %v803_v11 = vld [vmem:[#allocation2 + $0x3a0] sm:$0xff]  ;;  %v750_v63 = vld [vmem:[#allocation2 + $0x1f8] sm:$0xff] }
 0x13e   :  { %v741_v7 = vld [vmem:[#allocation2 + $0x1b0] sm:$0xff]  ;;  %v739_v60 = vld [vmem:[#allocation2 + $0x1a0] sm:$0xff]  ;;  %885 = vmatpush.msra.mxu3 %v805_v6  ;;  %866 = vmatpush.msra.mxu2 %v771_v9  ;;  %v778_v0 = vld [vmem:[#allocation2 + $0x2d8] sm:$0xff] }
 0x13f   :  { %845 = vmatpush.msra.mxu1 %v741_v7  ;;  %v769_v1 = vld [vmem:[#allocation2 + $0x290] sm:$0xff]  ;;  %826 = vmatpush.msra.mxu0 %v707_v10  ;;  %v767_v13 = vld [vmem:[#allocation2 + $0x280] sm:$0xff]  ;;  %v812_v3 = vld [vmem:[#allocation2 + $0x3e8] sm:$0xff] }
 0x140   :  { %v705_v2 = vld [vmem:[#allocation2 + $0x90] sm:$0xff]  ;;  %886 = vmatpush.msra.mxu3 %v803_v11  ;;  %v703_v14 = vld [vmem:[#allocation2 + $0x80] sm:$0xff]  ;;  %867 = vmatpush.msra.mxu2 %v769_v1  ;;  %v714_v4 = vld [vmem:[#allocation2 + $0xd8] sm:$0xff] }
 0x141   :  { %v801_v8 = vld [vmem:[#allocation2 + $0x390] sm:$0xff]  ;;  %846 = vmatpush.msra.mxu1 %v739_v60  ;;  %827 = vmatpush.msra.mxu0 %v705_v2  ;;  %v799_v15 = vld [vmem:[#allocation2 + $0x380] sm:$0xff]  ;;  %v748_v5 = vld [vmem:[#allocation2 + $0x1e8] sm:$0xff] }
 0x142   :  { %v737_v12 = vld [vmem:[#allocation2 + $0x190] sm:$0xff]  ;;  %v735_v16 = vld [vmem:[#allocation2 + $0x180] sm:$0xff]  ;;  %887 = vmatpush.msra.mxu3 %v801_v8  ;;  %868 = vmatpush.msra.mxu2 %v767_v13  ;;  %v776_v6 = vld [vmem:[#allocation2 + $0x2c8] sm:$0xff] }
 0x143   :  { %847 = vmatpush.msra.mxu1 %v737_v12  ;;  %v765_v19 = vld [vmem:[#allocation2 + $0x270] sm:$0xff]  ;;  %828 = vmatpush.msra.mxu0 %v703_v14  ;;  %v763_v23 = vld [vmem:[#allocation2 + $0x260] sm:$0xff]  ;;  %v810_v7 = vld [vmem:[#allocation2 + $0x3d8] sm:$0xff] }
 0x144   :  { %v701_v20 = vld [vmem:[#allocation2 + $0x70] sm:$0xff]  ;;  %888 = vmatpush.msra.mxu3 %v799_v15  ;;  %v699_v24 = vld [vmem:[#allocation2 + $0x60] sm:$0xff]  ;;  %869 = vmatpush.msra.mxu2 %v765_v19  ;;  %v712_v9 = vld [vmem:[#allocation2 + $0xc8] sm:$0xff] }
 0x145   :  { %v797_v21 = vld [vmem:[#allocation2 + $0x370] sm:$0xff]  ;;  %848 = vmatpush.msra.mxu1 %v735_v16  ;;  %829 = vmatpush.msra.mxu0 %v701_v20  ;;  %v795_v25 = vld [vmem:[#allocation2 + $0x360] sm:$0xff]  ;;  %v746_v10 = vld [vmem:[#allocation2 + $0x1d8] sm:$0xff] }
 0x146   :  { %v733_v22 = vld [vmem:[#allocation2 + $0x170] sm:$0xff]  ;;  %v731_v26 = vld [vmem:[#allocation2 + $0x160] sm:$0xff]  ;;  %889 = vmatpush.msra.mxu3 %v797_v21  ;;  %870 = vmatpush.msra.mxu2 %v763_v23  ;;  %v774_v11 = vld [vmem:[#allocation2 + $0x2b8] sm:$0xff] }
 0x147   :  { %849 = vmatpush.msra.mxu1 %v733_v22  ;;  %v761_v29 = vld [vmem:[#allocation2 + $0x250] sm:$0xff]  ;;  %830 = vmatpush.msra.mxu0 %v699_v24  ;;  %v759_v33 = vld [vmem:[#allocation2 + $0x240] sm:$0xff]  ;;  %v808_v60 = vld [vmem:[#allocation2 + $0x3c8] sm:$0xff] }
 0x148   :  { %v697_v30 = vld [vmem:[#allocation2 + $0x50] sm:$0xff]  ;;  %890 = vmatpush.msra.mxu3 %v795_v25  ;;  %v695_v34 = vld [vmem:[#allocation2 + $0x40] sm:$0xff]  ;;  %871 = vmatpush.msra.mxu2 %v761_v29  ;;  %v710_v1 = vld [vmem:[#allocation2 + $0xb8] sm:$0xff] }
 0x149   :  { %v793_v31 = vld [vmem:[#allocation2 + $0x350] sm:$0xff]  ;;  %850 = vmatpush.msra.mxu1 %v731_v26  ;;  %831 = vmatpush.msra.mxu0 %v697_v30  ;;  %v791_v35 = vld [vmem:[#allocation2 + $0x340] sm:$0xff]  ;;  %v744_v2 = vld [vmem:[#allocation2 + $0x1c8] sm:$0xff] }
 0x14a   :  { %v729_v32 = vld [vmem:[#allocation2 + $0x150] sm:$0xff]  ;;  %v727_v36 = vld [vmem:[#allocation2 + $0x140] sm:$0xff]  ;;  %891 = vmatpush.msra.mxu3 %v793_v31  ;;  %872 = vmatpush.msra.mxu2 %v759_v33  ;;  %v772_v8 = vld [vmem:[#allocation2 + $0x2a8] sm:$0xff] }
 0x14b   :  { %851 = vmatpush.msra.mxu1 %v729_v32  ;;  %v757_v37 = vld [vmem:[#allocation2 + $0x230] sm:$0xff]  ;;  %832 = vmatpush.msra.mxu0 %v695_v34  ;;  %v755_v43 = vld [vmem:[#allocation2 + $0x220] sm:$0xff]  ;;  %v806_v12 = vld [vmem:[#allocation2 + $0x3b8] sm:$0xff] }
 0x14c   :  { %v693_v40 = vld [vmem:[#allocation2 + $0x30] sm:$0xff]  ;;  %892 = vmatpush.msra.mxu3 %v791_v35  ;;  %v691_v44 = vld [vmem:[#allocation2 + $0x20] sm:$0xff]  ;;  %873 = vmatpush.msra.mxu2 %v757_v37  ;;  %v708_v13 = vld [vmem:[#allocation2 + $0xa8] sm:$0xff] }
 0x14d   :  { %v789_v41 = vld [vmem:[#allocation2 + $0x330] sm:$0xff]  ;;  %852 = vmatpush.msra.mxu1 %v727_v36  ;;  %833 = vmatpush.msra.mxu0 %v693_v40  ;;  %v787_v45 = vld [vmem:[#allocation2 + $0x320] sm:$0xff]  ;;  %v742_v14 = vld [vmem:[#allocation2 + $0x1b8] sm:$0xff] }
 0x14e   :  { %v725_v42 = vld [vmem:[#allocation2 + $0x130] sm:$0xff]  ;;  %v723_v46 = vld [vmem:[#allocation2 + $0x120] sm:$0xff]  ;;  %893 = vmatpush.msra.mxu3 %v789_v41  ;;  %874 = vmatpush.msra.mxu2 %v755_v43  ;;  %v770_v15 = vld [vmem:[#allocation2 + $0x298] sm:$0xff] }
 0x14f   :  { %853 = vmatpush.msra.mxu1 %v725_v42  ;;  %v753_v49 = vld [vmem:[#allocation2 + $0x210] sm:$0xff]  ;;  %834 = vmatpush.msra.mxu0 %v691_v44  ;;  %v751_v53 = vld [vmem:[#allocation2 + $0x200] sm:$0xff]  ;;  %v804_v16 = vld [vmem:[#allocation2 + $0x3a8] sm:$0xff] }
 0x150   :  { %v689_v50 = vld [vmem:[#allocation2 + $0x10] sm:$0xff]  ;;  %894 = vmatpush.msra.mxu3 %v787_v45  ;;  %v687_v54 = vld [vmem:[#allocation2] sm:$0xff]  ;;  %875 = vmatpush.msra.mxu2 %v753_v49  ;;  %v706_v19 = vld [vmem:[#allocation2 + $0x98] sm:$0xff] }
 0x151   :  { %v785_v51 = vld [vmem:[#allocation2 + $0x310] sm:$0xff]  ;;  %854 = vmatpush.msra.mxu1 %v723_v46  ;;  %835 = vmatpush.msra.mxu0 %v689_v50  ;;  %v783_v56 = vld [vmem:[#allocation2 + $0x300] sm:$0xff]  ;;  %v740_v20 = vld [vmem:[#allocation2 + $0x1a8] sm:$0xff] }
 0x152   :  { %v721_v52 = vld [vmem:[#allocation2 + $0x110] sm:$0xff]  ;;  %895 = vmatpush.msra.mxu3 %v785_v51  ;;  %876 = vmatpush.msra.mxu2 %v751_v53  ;;  %v719_v61 = vld [vmem:[#allocation2 + $0x100] sm:$0xff]  ;;  %v768_v21 = vld [vmem:[#allocation2 + $0x288] sm:$0xff] }
 0x153   :  { %855 = vmatpush.msra.mxu1 %v721_v52  ;;  %836 = vmatpush.msra.mxu0 %v687_v54  ;;  %v802_v22 = vld [vmem:[#allocation2 + $0x398] sm:$0xff]  ;;  %v704_v23 = vld [vmem:[#allocation2 + $0x88] sm:$0xff] }
 0x154   :  { %941 = vmatpush.msrb.mxu2 %v782_v55  ;;  %896 = vmatpush.msra.mxu3 %v783_v56  ;;  %v738_v24 = vld [vmem:[#allocation2 + $0x198] sm:$0xff]  ;;  %v800_v26 = vld [vmem:[#allocation2 + $0x388] sm:$0xff] }
 0x155   :  { %901 = vmatpush.msrb.mxu0 %v718_v57  ;;  %856 = vmatpush.msra.mxu1 %v719_v61  ;;  %v766_v25 = vld [vmem:[#allocation2 + $0x278] sm:$0xff]  ;;  %v736_v30 = vld [vmem:[#allocation2 + $0x188] sm:$0xff] }
 0x156   :  { %961 = vmatpush.msrb.mxu3 %v814_v58  ;;  %942 = vmatpush.msrb.mxu2 %v780_v59  ;;  %v702_v29 = vld [vmem:[#allocation2 + $0x78] sm:$0xff]  ;;  %v764_v31 = vld [vmem:[#allocation2 + $0x268] sm:$0xff] }
 0x157   :  { %902 = vmatpush.msrb.mxu0 %v716_v62  ;;  %921 = vmatpush.msrb.mxu1 %v750_v63  ;;  %v798_v32 = vld [vmem:[#allocation2 + $0x378] sm:$0xff]  ;;  %v700_v33 = vld [vmem:[#allocation2 + $0x68] sm:$0xff] }
 0x158   :  { %943 = vmatpush.msrb.mxu2 %v778_v0  ;;  %962 = vmatpush.msrb.mxu3 %v812_v3  ;;  %v734_v34 = vld [vmem:[#allocation2 + $0x178] sm:$0xff]  ;;  %v796_v36 = vld [vmem:[#allocation2 + $0x368] sm:$0xff] }
 0x159   :  { %903 = vmatpush.msrb.mxu0 %v714_v4  ;;  %922 = vmatpush.msrb.mxu1 %v748_v5  ;;  %v762_v35 = vld [vmem:[#allocation2 + $0x258] sm:$0xff]  ;;  %v732_v40 = vld [vmem:[#allocation2 + $0x168] sm:$0xff]  ;;  %v815_v4 = vld [vmem:[%s1870_s3] sm:$0x3] }
 0x15a   :  { %944 = vmatpush.msrb.mxu2 %v776_v6  ;;  %963 = vmatpush.msrb.mxu3 %v810_v7  ;;  %v698_v37 = vld [vmem:[#allocation2 + $0x58] sm:$0xff]  ;;  %v760_v41 = vld [vmem:[#allocation2 + $0x248] sm:$0xff]  ;;  %v817_v38 = vperm.slane %v815_v4, 0 }
 0x15b   :  { %904 = vmatpush.msrb.mxu0 %v712_v9  ;;  %923 = vmatpush.msrb.mxu1 %v746_v10  ;;  %v794_v42 = vld [vmem:[#allocation2 + $0x358] sm:$0xff]  ;;  %v696_v43 = vld [vmem:[#allocation2 + $0x48] sm:$0xff] }
 0x15c   :  { %945 = vmatpush.msrb.mxu2 %v774_v11  ;;  %964 = vmatpush.msrb.mxu3 %v808_v60  ;;  %v730_v44 = vld [vmem:[#allocation2 + $0x158] sm:$0xff]  ;;  %v792_v46 = vld [vmem:[#allocation2 + $0x348] sm:$0xff] }
 0x15d   :  { %905 = vmatpush.msrb.mxu0 %v710_v1  ;;  %924 = vmatpush.msrb.mxu1 %v744_v2  ;;  %v758_v45 = vld [vmem:[#allocation2 + $0x238] sm:$0xff]  ;;  %v728_v50 = vld [vmem:[#allocation2 + $0x148] sm:$0xff] }
 0x15e   :  { %946 = vmatpush.msrb.mxu2 %v772_v8  ;;  %965 = vmatpush.msrb.mxu3 %v806_v12  ;;  %v694_v49 = vld [vmem:[#allocation2 + $0x38] sm:$0xff]  ;;  %v756_v51 = vld [vmem:[#allocation2 + $0x228] sm:$0xff] }
 0x15f   :  { %906 = vmatpush.msrb.mxu0 %v708_v13  ;;  %925 = vmatpush.msrb.mxu1 %v742_v14  ;;  %v790_v52 = vld [vmem:[#allocation2 + $0x338] sm:$0xff]  ;;  %v692_v53 = vld [vmem:[#allocation2 + $0x28] sm:$0xff] }
 0x160   :  { %947 = vmatpush.msrb.mxu2 %v770_v15  ;;  %966 = vmatpush.msrb.mxu3 %v804_v16  ;;  %v726_v54 = vld [vmem:[#allocation2 + $0x138] sm:$0xff]  ;;  %v788_v56 = vld [vmem:[#allocation2 + $0x328] sm:$0xff] }
 0x161   :  { %907 = vmatpush.msrb.mxu0 %v706_v19  ;;  %926 = vmatpush.msrb.mxu1 %v740_v20  ;;  %v754_v55 = vld [vmem:[#allocation2 + $0x218] sm:$0xff]  ;;  %v724_v58 = vld [vmem:[#allocation2 + $0x128] sm:$0xff] }
 0x162   :  { %948 = vmatpush.msrb.mxu2 %v768_v21  ;;  %967 = vmatpush.msrb.mxu3 %v802_v22  ;;  %v690_v57 = vld [vmem:[#allocation2 + $0x18] sm:$0xff]  ;;  %v752_v59 = vld [vmem:[#allocation2 + $0x208] sm:$0xff] }
 0x163   :  { %908 = vmatpush.msrb.mxu0 %v704_v23  ;;  %927 = vmatpush.msrb.mxu1 %v738_v24  ;;  %v786_v61 = vld [vmem:[#allocation2 + $0x318] sm:$0xff]  ;;  %v688_v62 = vld [vmem:[#allocation2 + $0x8] sm:$0xff] }
 0x164   :  { %949 = vmatpush.msrb.mxu2 %v766_v25  ;;  %968 = vmatpush.msrb.mxu3 %v800_v26  ;;  %v722_v63 = vld [vmem:[#allocation2 + $0x118] sm:$0xff]  ;;  %v784_v0 = vld [vmem:[#allocation2 + $0x308] sm:$0xff] }
 0x165   :  { %909 = vmatpush.msrb.mxu0 %v702_v29  ;;  %928 = vmatpush.msrb.mxu1 %v736_v30  ;;  %v720_v3 = vld [vmem:[#allocation2 + $0x108] sm:$0xff] }
 0x166   :  { %950 = vmatpush.msrb.mxu2 %v764_v31  ;;  %969 = vmatpush.msrb.mxu3 %v798_v32 }
 0x167   :  { %910 = vmatpush.msrb.mxu0 %v700_v33  ;;  %929 = vmatpush.msrb.mxu1 %v734_v34 }
 0x168   :  { %951 = vmatpush.msrb.mxu2 %v762_v35  ;;  %970 = vmatpush.msrb.mxu3 %v796_v36 }
 0x169   :  { %911 = vmatpush.msrb.mxu0 %v698_v37  ;;  %930 = vmatpush.msrb.mxu1 %v732_v40 }
 0x16a   :  { %952 = vmatpush.msrb.mxu2 %v760_v41  ;;  %971 = vmatpush.msrb.mxu3 %v794_v42 }
 0x16b   :  { %877 = vmatmul.f32.vlgmr.msra.gmra.mxu2 %v681_v39  ;;  %912 = vmatpush.msrb.mxu0 %v696_v43 }
 0x16c   :  { %931 = vmatpush.msrb.mxu1 %v730_v44  ;;  %953 = vmatpush.msrb.mxu2 %v758_v45 }
 0x16d   :  { %972 = vmatpush.msrb.mxu3 %v792_v46  ;;  %837 = vmatmul.f32.vlgmr.msra.gmra.mxu0 %v679_v18 }
 0x16e   :  { %897 = vmatmul.f32.vlgmr.msra.gmra.mxu3 %v682_v48  ;;  %913 = vmatpush.msrb.mxu0 %v694_v49 }
 0x16f   :  { %932 = vmatpush.msrb.mxu1 %v728_v50  ;;  %954 = vmatpush.msrb.mxu2 %v756_v51 }
 0x170   :  { %973 = vmatpush.msrb.mxu3 %v790_v52  ;;  %857 = vmatmul.f32.vlgmr.msra.gmra.mxu1 %v680_v28 }
 0x171   :  { %914 = vmatpush.msrb.mxu0 %v692_v53  ;;  %933 = vmatpush.msrb.mxu1 %v726_v54 }
 0x172   :  { %955 = vmatpush.msrb.mxu2 %v754_v55  ;;  %974 = vmatpush.msrb.mxu3 %v788_v56 }
 0x173   :  { %915 = vmatpush.msrb.mxu0 %v690_v57  ;;  %934 = vmatpush.msrb.mxu1 %v724_v58 }
 0x174   :  { %956 = vmatpush.msrb.mxu2 %v752_v59  ;;  %975 = vmatpush.msrb.mxu3 %v786_v61 }
 0x175   :  { %957 = vmatmul.f32.vlgmr.msrb.gmra.mxu2 %v681_v39  ;;  %916 = vmatpush.msrb.mxu0 %v688_v62 }
 0x176   :  { %935 = vmatpush.msrb.mxu1 %v722_v63  ;;  %976 = vmatpush.msrb.mxu3 %v784_v0 }
 0x177   :  { %917 = vmatmul.f32.vlgmr.msrb.gmra.mxu0 %v679_v18  ;;  %977 = vmatmul.f32.vlgmr.msrb.gmra.mxu3 %v682_v48  ;;  %v818_v18 = vperm.slane %v815_v4, 1 }
 0x178   :  { %936 = vmatpush.msrb.mxu1 %v720_v3 }
 0x179   :  { %937 = vmatmul.f32.vlgmr.msrb.gmra.mxu1 %v680_v28 }
 0x1ea   :  { %v838_v39 = vpop.f32.mrf.mxu0 }
 0x1eb   :  { %v839_v5 = vadd.f32 %v838_v39, %v817_v38 }
 0x1ed   :  { %v858_v6 = vpop.f32.mrf.mxu1 }
 0x1ee   :  { %v859_v7 = vadd.f32 %v858_v6, %v839_v5  ;;  %v878_v9 = vpop.f32.mrf.mxu2 }
 0x1f0   :  { %v879_v10 = vadd.f32 %v878_v9, %v859_v7 }
 0x1f1   :  { %v898_v17 = vpop.f32.mrf.mxu3 }
 0x1f2   :  { %v1758_v11 = vadd.f32 %v898_v17, %v879_v10 }
 0x1f4   :  { %v981_v47 = vmax.f32 %v1758_v11, 0.0  ;;  %v918_v48 = vpop.f32.mrf.mxu0 }
 0x1f5   :  { %v919_v27 = vadd.f32 %v918_v48, %v818_v18 }
 0x1f6   :  { %v938_v28 = vpop.f32.mrf.mxu1 }
 0x1f7   :  { %v939_v60 = vadd.f32 %v938_v28, %v919_v27 }
 0x1f8   :  { %v958_v1 = vpop.f32.mrf.mxu2 }
 0x1f9   :  { %v959_v2 = vadd.f32 %v958_v1, %v939_v60 }
 0x1fa   :  { %v978_v8 = vpop.f32.mrf.mxu3 }
 0x1fb   :  { %v1761_v12 = vadd.f32 %v978_v8, %v959_v2 }
 0x1fd   :  { %v982_v13 = vmax.f32 %v1761_v12, 0.0 }
 0x1fe   :  { %1602 = dma.done.wait [#allocation5 + $0x1], 4096 }
 0x1ff   :  { %1603 = vsyncadd [#allocation5 + $0x1], 4294963200  ;;  %v1001_v14 = vld [vmem:[#allocation3 + $0x78] sm:$0xff]  ;;  %v1000_v15 = vld [vmem:[#allocation3 + $0x70] sm:$0xff] }
 0x200   :  { %v1017_v16 = vld [vmem:[#allocation3 + $0xf8] sm:$0xff]  ;;  %1022 = vmatpush.msra.mxu0 %v1001_v14  ;;  %v1016_v19 = vld [vmem:[#allocation3 + $0xf0] sm:$0xff]  ;;  %v999_v20 = vld [vmem:[#allocation3 + $0x68] sm:$0xff] }
 0x201   :  { %1042 = vmatpush.msra.mxu1 %v1017_v16  ;;  %v1015_v21 = vld [vmem:[#allocation3 + $0xe8] sm:$0xff]  ;;  %v998_v22 = vld [vmem:[#allocation3 + $0x60] sm:$0xff]  ;;  %v997_v24 = vld [vmem:[#allocation3 + $0x58] sm:$0xff] }
 0x202   :  { %1023 = vmatpush.msra.mxu0 %v1000_v15  ;;  %v1014_v23 = vld [vmem:[#allocation3 + $0xe0] sm:$0xff]  ;;  %v1013_v25 = vld [vmem:[#allocation3 + $0xd8] sm:$0xff]  ;;  %v996_v26 = vld [vmem:[#allocation3 + $0x50] sm:$0xff] }
 0x203   :  { %1043 = vmatpush.msra.mxu1 %v1016_v19  ;;  %v1012_v29 = vld [vmem:[#allocation3 + $0xd0] sm:$0xff]  ;;  %v995_v30 = vld [vmem:[#allocation3 + $0x48] sm:$0xff]  ;;  %v994_v32 = vld [vmem:[#allocation3 + $0x40] sm:$0xff] }
 0x204   :  { %1024 = vmatpush.msra.mxu0 %v999_v20  ;;  %v1011_v31 = vld [vmem:[#allocation3 + $0xc8] sm:$0xff]  ;;  %v1010_v33 = vld [vmem:[#allocation3 + $0xc0] sm:$0xff]  ;;  %v993_v34 = vld [vmem:[#allocation3 + $0x38] sm:$0xff] }
 0x205   :  { %1044 = vmatpush.msra.mxu1 %v1015_v21  ;;  %v1009_v35 = vld [vmem:[#allocation3 + $0xb8] sm:$0xff]  ;;  %v992_v36 = vld [vmem:[#allocation3 + $0x30] sm:$0xff]  ;;  %v991_v40 = vld [vmem:[#allocation3 + $0x28] sm:$0xff] }
 0x206   :  { %1025 = vmatpush.msra.mxu0 %v998_v22  ;;  %v1008_v37 = vld [vmem:[#allocation3 + $0xb0] sm:$0xff]  ;;  %v1007_v41 = vld [vmem:[#allocation3 + $0xa8] sm:$0xff]  ;;  %v990_v42 = vld [vmem:[#allocation3 + $0x20] sm:$0xff] }
 0x207   :  { %1045 = vmatpush.msra.mxu1 %v1014_v23  ;;  %v1006_v43 = vld [vmem:[#allocation3 + $0xa0] sm:$0xff]  ;;  %v989_v44 = vld [vmem:[#allocation3 + $0x18] sm:$0xff]  ;;  %v988_v46 = vld [vmem:[#allocation3 + $0x10] sm:$0xff] }
 0x208   :  { %1026 = vmatpush.msra.mxu0 %v997_v24  ;;  %v1005_v45 = vld [vmem:[#allocation3 + $0x98] sm:$0xff]  ;;  %v1004_v49 = vld [vmem:[#allocation3 + $0x90] sm:$0xff]  ;;  %v987_v50 = vld [vmem:[#allocation3 + $0x8] sm:$0xff] }
 0x209   :  { %1046 = vmatpush.msra.mxu1 %v1013_v25  ;;  %v1003_v51 = vld [vmem:[#allocation3 + $0x88] sm:$0xff]  ;;  %v986_v52 = vld [vmem:[#allocation3] sm:$0xff] }
 0x20a   :  { %1027 = vmatpush.msra.mxu0 %v996_v26  ;;  %v1002_v53 = vld [vmem:[#allocation3 + $0x80] sm:$0xff] }
 0x20b   :  { %1047 = vmatpush.msra.mxu1 %v1012_v29  ;;  %v1460_v54 = vld [vmem:[%s1871_s4] ss:$0 sm:$0xff] }
 0x20c   :  { %1028 = vmatpush.msra.mxu0 %v995_v30 }
 0x20d   :  { %1048 = vmatpush.msra.mxu1 %v1011_v31 }
 0x20e   :  { %1029 = vmatpush.msra.mxu0 %v994_v32 }
 0x20f   :  { %1049 = vmatpush.msra.mxu1 %v1010_v33 }
 0x210   :  { %1030 = vmatpush.msra.mxu0 %v993_v34 }
 0x211   :  { %1050 = vmatpush.msra.mxu1 %v1009_v35 }
 0x212   :  { %1031 = vmatpush.msra.mxu0 %v992_v36 }
 0x213   :  { %1051 = vmatpush.msra.mxu1 %v1008_v37 }
 0x214   :  { %1032 = vmatpush.msra.mxu0 %v991_v40 }
 0x215   :  { %1052 = vmatpush.msra.mxu1 %v1007_v41 }
 0x216   :  { %1033 = vmatpush.msra.mxu0 %v990_v42 }
 0x217   :  { %1053 = vmatpush.msra.mxu1 %v1006_v43 }
 0x218   :  { %1034 = vmatpush.msra.mxu0 %v989_v44 }
 0x219   :  { %1054 = vmatpush.msra.mxu1 %v1005_v45 }
 0x21a   :  { %1035 = vmatpush.msra.mxu0 %v988_v46 }
 0x21b   :  { %1055 = vmatpush.msra.mxu1 %v1004_v49 }
 0x21c   :  { %1036 = vmatpush.msra.mxu0 %v987_v50 }
 0x21d   :  { %1056 = vmatpush.msra.mxu1 %v1003_v51 }
 0x21e   :  { %1037 = vmatpush.msra.mxu0 %v986_v52 }
 0x21f   :  { %1057 = vmatpush.msra.mxu1 %v1002_v53  ;;  %1038 = vmatmul.f32.vlgmr.msra.gmra.mxu0 %v981_v47 }
 0x220   :  { %1058 = vmatmul.f32.vlgmr.msra.gmra.mxu1 %v982_v13 }
 0x29c   :  { %v1039_v55 = vpop.f32.mrf.mxu0 }
 0x29d   :  { %v1059_v56 = vpop.f32.mrf.mxu1  ;;  %v1040_v57 = vadd.f32 %v1460_v54, %v1039_v55 }
 0x29f   :  { %v1060_v58 = vadd.f32 %v1059_v56, %v1040_v57 }
 0x2a1   :  { %v1771_v59 = vmax.f32 %v1060_v58, 0.0 }
 0x2a2   :  { %1604 = dma.done.wait [#allocation5 + $0x2], 6144 }
 0x2a3   :  { %1605 = vsyncadd [#allocation5 + $0x2], 4294961152  ;;  %v1112_v61 = vld [vmem:[#allocation4 + $0x168] sm:$0xff]  ;;  %v1776_v62 = vld [vmem:[%s1872_s5 + $0x18] sm:$0xff]  ;;  %v1612_v9 = vmov 0.0   ;;  %s1613_s15 = smov 96  }
 0x2a4   :  { %v1109_v63 = vld [vmem:[#allocation4 + $0x150] sm:$0xff]  ;;  %1123 = vmatpush.msra.mxu2 %v1112_v61  ;;  %1207 = vmatpush.msrb.mxu1 %v1776_v62  ;;  %v1106_v3 = vld [vmem:[#allocation4 + $0x138] sm:$0xff]  ;;  %v1787_v4 = vld [vmem:[%s1872_s5 + $0x8] sm:$0xff]  ;;  %s1614_s16 = smov 64   ;;  %vm1191_vm0 = vcmask 261120  }
 0x2a5   :  { %v1782_v0 = vld [vmem:[%s1872_s5 + $0x10] sm:$0xff]  ;;  %v1103_v38 = vld [vmem:[#allocation4 + $0x120] sm:$0xff]  ;;  %v1100_v5 = vld [vmem:[#allocation4 + $0x108] sm:$0xff] }
 0x2a6   :  { %1124 = vmatpush.msra.mxu2 %v1109_v63  ;;  %1208 = vmatpush.msrb.mxu1 %v1782_v0  ;;  %v1793_v39 = vld [vmem:[%s1872_s5] sm:$0xff]  ;;  %v1113_v6 = vld [vmem:[#allocation4 + $0x170] sm:$0xff]  ;;  %v1110_v7 = vld [vmem:[#allocation4 + $0x158] sm:$0xff] }
 0x2a7   :  { %v1097_v10 = vld [vmem:[#allocation4 + $0xf0] sm:$0xff]  ;;  %1143 = vmatpush.msra.mxu3 %v1113_v6  ;;  %v1107_v17 = vld [vmem:[#allocation4 + $0x140] sm:$0xff]  ;;  %v1114_v18 = vld [vmem:[#allocation4 + $0x178] sm:$0xff] }
 0x2a8   :  { %1125 = vmatpush.msra.mxu2 %v1106_v3  ;;  %1209 = vmatpush.msrb.mxu1 %v1787_v4  ;;  %v1094_v11 = vld [vmem:[#allocation4 + $0xd8] sm:$0xff]  ;;  %v1111_v47 = vld [vmem:[#allocation4 + $0x160] sm:$0xff]  ;;  %v1104_v48 = vld [vmem:[#allocation4 + $0x128] sm:$0xff] }
 0x2a9   :  { %1144 = vmatpush.msra.mxu3 %v1110_v7  ;;  %1163 = vmatpush.msrb.mxu0 %v1114_v18  ;;  %v1108_v27 = vld [vmem:[#allocation4 + $0x148] sm:$0xff]  ;;  %v1091_v28 = vld [vmem:[#allocation4 + $0xc0] sm:$0xff]  ;;  %v1101_v60 = vld [vmem:[#allocation4 + $0x110] sm:$0xff] }
 0x2aa   :  { %1126 = vmatpush.msra.mxu2 %v1103_v38  ;;  %1210 = vmatpush.msrb.mxu1 %v1793_v39  ;;  %v1105_v1 = vld [vmem:[#allocation4 + $0x130] sm:$0xff]  ;;  %v1088_v2 = vld [vmem:[#allocation4 + $0xa8] sm:$0xff]  ;;  %v1098_v8 = vld [vmem:[#allocation4 + $0xf8] sm:$0xff] }
 0x2ab   :  { %1211 = vmatmul.f32.vlgmr.msrb.gmra.mxu1 %v1612_v9  ;;  %1145 = vmatpush.msra.mxu3 %v1107_v17  ;;  %v1102_v12 = vld [vmem:[#allocation4 + $0x118] sm:$0xff]  ;;  %v1085_v13 = vld [vmem:[#allocation4 + $0x90] sm:$0xff]  ;;  %v1095_v14 = vld [vmem:[#allocation4 + $0xe0] sm:$0xff] }
 0x2ac   :  { %1127 = vmatpush.msra.mxu2 %v1100_v5  ;;  %1371 = vmatpush.msra.mxu1 %v1776_v62  ;;  %v1099_v15 = vld [vmem:[#allocation4 + $0x100] sm:$0xff]  ;;  %v1082_v16 = vld [vmem:[#allocation4 + $0x78] sm:$0xff]  ;;  %v1092_v19 = vld [vmem:[#allocation4 + $0xc8] sm:$0xff] }
 0x2ad   :  { %1164 = vmatpush.msrb.mxu0 %v1111_v47  ;;  %1146 = vmatpush.msra.mxu3 %v1104_v48  ;;  %v1096_v20 = vld [vmem:[#allocation4 + $0xe8] sm:$0xff]  ;;  %v1079_v21 = vld [vmem:[#allocation4 + $0x60] sm:$0xff]  ;;  %v1089_v22 = vld [vmem:[#allocation4 + $0xb0] sm:$0xff] }
 0x2ae   :  { %1128 = vmatpush.msra.mxu2 %v1097_v10  ;;  %1372 = vmatpush.msra.mxu1 %v1782_v0  ;;  %v1093_v23 = vld [vmem:[#allocation4 + $0xd0] sm:$0xff]  ;;  %v1076_v24 = vld [vmem:[#allocation4 + $0x48] sm:$0xff]  ;;  %v1086_v25 = vld [vmem:[#allocation4 + $0x98] sm:$0xff] }
 0x2af   :  { %1165 = vmatpush.msrb.mxu0 %v1108_v27  ;;  %1147 = vmatpush.msra.mxu3 %v1101_v60  ;;  %v1090_v26 = vld [vmem:[#allocation4 + $0xb8] sm:$0xff]  ;;  %v1073_v29 = vld [vmem:[#allocation4 + $0x30] sm:$0xff]  ;;  %v1083_v30 = vld [vmem:[#allocation4 + $0x80] sm:$0xff] }
 0x2b0   :  { %1129 = vmatpush.msra.mxu2 %v1094_v11  ;;  %1373 = vmatpush.msra.mxu1 %v1787_v4  ;;  %v1087_v31 = vld [vmem:[#allocation4 + $0xa0] sm:$0xff]  ;;  %v1070_v32 = vld [vmem:[#allocation4 + $0x18] sm:$0xff]  ;;  %v1080_v33 = vld [vmem:[#allocation4 + $0x68] sm:$0xff] }
 0x2b1   :  { %1166 = vmatpush.msrb.mxu0 %v1105_v1  ;;  %1148 = vmatpush.msra.mxu3 %v1098_v8  ;;  %v1084_v34 = vld [vmem:[#allocation4 + $0x88] sm:$0xff]  ;;  %v1067_v35 = vld [vmem:[#allocation4] sm:$0xff]  ;;  %v1077_v36 = vld [vmem:[#allocation4 + $0x50] sm:$0xff] }
 0x2b2   :  { %1130 = vmatpush.msra.mxu2 %v1091_v28  ;;  %1374 = vmatpush.msra.mxu1 %v1793_v39  ;;  %v1081_v37 = vld [vmem:[#allocation4 + $0x70] sm:$0xff]  ;;  %v1074_v40 = vld [vmem:[#allocation4 + $0x38] sm:$0xff]  ;;  %v1071_v42 = vld [vmem:[#allocation4 + $0x20] sm:$0xff] }
 0x2b3   :  { %1167 = vmatpush.msrb.mxu0 %v1102_v12  ;;  %1149 = vmatpush.msra.mxu3 %v1095_v14  ;;  %v1078_v41 = vld [vmem:[#allocation4 + $0x58] sm:$0xff]  ;;  %v1075_v43 = vld [vmem:[#allocation4 + $0x40] sm:$0xff]  ;;  %v1068_v44 = vld [vmem:[#allocation4 + $0x8] sm:$0xff] }
 0x2b4   :  { %1131 = vmatpush.msra.mxu2 %v1088_v2  ;;  %v1072_v45 = vld [vmem:[#allocation4 + $0x28] sm:$0xff]  ;;  %v1069_v46 = vld [vmem:[#allocation4 + $0x10] sm:$0xff]  ;;  %v1815_v49 = vld [vmem:[%s1874_s7] ss:$0 sm:$0xff] }
 0x2b5   :  { %1168 = vmatpush.msrb.mxu0 %v1099_v15  ;;  %1150 = vmatpush.msra.mxu3 %v1092_v19  ;;  %v1115_v52 = vld [vmem:[%s1873_s6] sm:$0x7] }
 0x2b6   :  { %1132 = vmatpush.msra.mxu2 %v1085_v13  ;;  %v1117_v53 = vperm.slane %v1115_v52, 0 }
 0x2b7   :  { %1169 = vmatpush.msrb.mxu0 %v1096_v20  ;;  %1151 = vmatpush.msra.mxu3 %v1089_v22 }
 0x2b8   :  { %1133 = vmatpush.msra.mxu2 %v1082_v16 }
 0x2b9   :  { %1170 = vmatpush.msrb.mxu0 %v1093_v23  ;;  %1152 = vmatpush.msra.mxu3 %v1086_v25 }
 0x2ba   :  { %1134 = vmatpush.msra.mxu2 %v1079_v21 }
 0x2bb   :  { %1171 = vmatpush.msrb.mxu0 %v1090_v26  ;;  %1153 = vmatpush.msra.mxu3 %v1083_v30 }
 0x2bc   :  { %1135 = vmatpush.msra.mxu2 %v1076_v24 }
 0x2bd   :  { %1172 = vmatpush.msrb.mxu0 %v1087_v31  ;;  %1154 = vmatpush.msra.mxu3 %v1080_v33 }
 0x2be   :  { %1136 = vmatpush.msra.mxu2 %v1073_v29 }
 0x2bf   :  { %1173 = vmatpush.msrb.mxu0 %v1084_v34  ;;  %1155 = vmatpush.msra.mxu3 %v1077_v36 }
 0x2c0   :  { %1137 = vmatpush.msra.mxu2 %v1070_v32 }
 0x2c1   :  { %1174 = vmatpush.msrb.mxu0 %v1081_v37  ;;  %1156 = vmatpush.msra.mxu3 %v1074_v40 }
 0x2c2   :  { %1138 = vmatpush.msra.mxu2 %v1067_v35 }
 0x2c3   :  { %1139 = vmatmul.f32.vlgmr.msra.gmra.mxu2 %v1771_v59  ;;  %1175 = vmatpush.msrb.mxu0 %v1078_v41 }
 0x2c4   :  { %1255 = vmatpush.msrb.mxu2 %v1776_v62  ;;  %1157 = vmatpush.msra.mxu3 %v1071_v42 }
 0x2c5   :  { %1176 = vmatpush.msrb.mxu0 %v1075_v43 }
 0x2c6   :  { %1256 = vmatpush.msrb.mxu2 %v1782_v0  ;;  %1158 = vmatpush.msra.mxu3 %v1068_v44 }
 0x2c7   :  { %1159 = vmatmul.f32.vlgmr.msra.gmra.mxu3 %v1771_v59  ;;  %1177 = vmatpush.msrb.mxu0 %v1072_v45 }
 0x2c8   :  { %1257 = vmatpush.msrb.mxu2 %v1787_v4  ;;  %1313 = vmatpush.msrb.mxu3 %v1776_v62 }
 0x2c9   :  { %1178 = vmatpush.msrb.mxu0 %v1069_v46 }
 0x2ca   :  { %1258 = vmatpush.msrb.mxu2 %v1793_v39  ;;  %1179 = vmatmul.f32.vlgmr.msrb.gmra.mxu0 %v1771_v59  ;;  %v1118_v59 = vperm.slane %v1115_v52, 1 }
 0x2cb   :  { %1314 = vmatpush.msrb.mxu3 %v1782_v0 }
 0x2cd   :  { %1315 = vmatpush.msrb.mxu3 %v1787_v4 }
 0x2cf   :  { %1316 = vmatpush.msrb.mxu3 %v1793_v39  ;;  %v1119_v39 = vperm.slane %v1115_v52, 2 }
 0x328   :  { %v1212_v50 = vpop.f32.mrf.mxu1 }
 0x329   :  { %v1213_v51 = vadd.f32 %v1815_v49, %v1212_v50 }
 0x32b   :  { %1222 = vrot.lane.b32.xlu0 %v1213_v51, %s1613_s15 }
 0x333   :  { %1231 = vrot.lane.b32.xlu0 %v1213_v51, %s1614_s16 }
 0x346   :  { %v1140_v54 = vpop.f32.mrf.mxu2 }
 0x347   :  { %v1823_v55 = vadd.f32 %v1140_v54, %v1117_v53  ;;  %v1180_v5 = vpop.f32.mrf.mxu0 }
 0x348   :  { %v1829_v7 = vadd.f32 %v1180_v5, %v1119_v39 }
 0x349   :  { %v1215_v56 = vadd.f32 %v1213_v51, %v1823_v55 }
 0x34a   :  { %v1160_v61 = vpop.f32.mrf.mxu3 }
 0x34b   :  { %v1216_v57 = vsub.f32 0.0, %v1215_v56  ;;  %v1826_v63 = vadd.f32 %v1160_v61, %v1118_v59 }
 0x34d   :  { %v1217_v58 = vmul.f32 1.442695, %v1216_v57 }
 0x34f   :  { %1462 = vpow2.f32 %v1217_v58 }
 0x355   :  { %v1463_v62 = vpop.eup %1462 }
 0x356   :  { %v1219_v0 = vadd.f32 1.0, %v1463_v62 }
 0x358   :  { %1464 = vrcp.f32 %v1219_v0 }
 0x35e   :  { %v1465_v9 = vpop.eup %1464 }
 0x39d   :  { %v1223_v3 = vpop.permute.xlu0 %1222 }
 0x39e   :  { %v1225_v4 = vadd.f32 %v1223_v3, %v1826_v63 }
 0x3a0   :  { %v1226_v38 = vsub.f32 0.0, %v1225_v4 }
 0x3a2   :  { %v1227_v6 = vmul.f32 1.442695, %v1226_v38 }
 0x3a4   :  { %1466 = vpow2.f32 %v1227_v6 }
 0x3a5   :  { %v1232_v10 = vpop.permute.xlu0 %1231 }
 0x3a6   :  { %v1234_v17 = vmul.f32 %v1465_v9, %v1232_v10 }
 0x3a8   :  { %v1235_v18 = vadd.f32 %v1234_v17, %v1829_v7 }
 0x3aa   :  { %v1467_v11 = vpop.eup %1466  ;;  %1468 = vtanh.f32 %v1235_v18 }
 0x3ab   :  { %v1229_v47 = vadd.f32 1.0, %v1467_v11 }
 0x3ad   :  { %1470 = vrcp.f32 %v1229_v47 }
 0x3b0   :  { %v1469_v48 = vpop.eup %1468 }
 0x3b1   :  { %v1237_v27 = vsub.f32 0.0, %v1469_v48 }
 0x3b3   :  { %v1471_v28 = vpop.eup %1470 }
 0x3b4   :  { %v1238_v60 = vmul.f32 %v1471_v28, %v1237_v27 }
 0x3b6   :  { %v1239_v1 = vadd.f32 %v1469_v48, %v1238_v60 }
 0x3b8   :  { %1445 = vmatmul.msk.f32.vlgmr.msrb.gmra.mxu2 %vm1191_vm0, %v1239_v1 }
 0x43b   :  { %v1260_v2 = vpop.f32.mrf.mxu2 }
 0x43c   :  { %v1261_v8 = vadd.f32 %v1815_v49, %v1260_v2 }
 0x43e   :  { %1264 = vrot.lane.b32.xlu1 %v1261_v8, %s1608_s23  ;;  %v1273_v29 = vadd.f32 %v1261_v8, %v1826_v63 }
 0x440   :  { %v1274_v30 = vsub.f32 0.0, %v1273_v29 }
 0x442   :  { %v1275_v31 = vmul.f32 1.442695, %v1274_v30 }
 0x446   :  { %1279 = vrot.lane.b32.xlu1 %v1261_v8, %s1613_s15 }
 0x4b0   :  { %v1265_v12 = vpop.permute.xlu1 %1264 }
 0x4b1   :  { %v1267_v13 = vadd.f32 %v1265_v12, %v1823_v55 }
 0x4b3   :  { %v1268_v14 = vsub.f32 0.0, %v1267_v13 }
 0x4b5   :  { %v1269_v15 = vmul.f32 1.442695, %v1268_v14 }
 0x4b7   :  { %1472 = vpow2.f32 %v1269_v15 }
 0x4b8   :  { %v1280_v21 = vpop.permute.xlu1 %1279 }
 0x4bd   :  { %v1473_v16 = vpop.eup %1472 }
 0x4be   :  { %v1271_v19 = vadd.f32 1.0, %v1473_v16 }
 0x4c0   :  { %1474 = vrcp.f32 %v1271_v19 }
 0x4c6   :  { %v1475_v20 = vpop.eup %1474 }
 0x4c7   :  { %v1282_v22 = vmul.f32 %v1475_v20, %v1280_v21 }
 0x4c9   :  { %v1283_v23 = vadd.f32 %v1282_v22, %v1829_v7 }
 0x4cb   :  { %1476 = vtanh.f32 %v1283_v23 }
 0x4cc   :  { %1478 = vpow2.f32 %v1275_v31 }
 0x4d1   :  { %v1477_v24 = vpop.eup %1476 }
 0x4d2   :  { %1286 = vrot.lane.b32.xlu2 %v1477_v24, %s1613_s15  ;;  %v1479_v32 = vpop.eup %1478 }
 0x4d3   :  { %v1277_v33 = vadd.f32 1.0, %v1479_v32 }
 0x4d5   :  { %1480 = vrcp.f32 %v1277_v33 }
 0x4db   :  { %v1481_v34 = vpop.eup %1480 }
 0x52c   :  { %v1287_v25 = vpop.permute.xlu2 %1286 }
 0x52d   :  { %v1289_v26 = vsub.f32 %v1239_v1, %v1287_v25 }
 0x52f   :  { %1291 = vrot.lane.b32.xlu2 %v1289_v26, %s1608_s23 }
 0x589   :  { %v1292_v35 = vpop.permute.xlu2 %1291 }
 0x58a   :  { %v1294_v36 = vmul.f32 %v1481_v34, %v1292_v35 }
 0x58c   :  { %v1295_v37 = vadd.f32 %v1477_v24, %v1294_v36 }
 0x58e   :  { %1297 = vrot.lane.b32.xlu0 %v1295_v37, %s1613_s15 }
 0x600   :  { %v1298_v40 = vpop.permute.xlu0 %1297 }
 0x601   :  { %1446 = vmatmul.msk.f32.vlgmr.msrb.gmra.mxu3 %vm1191_vm0, %v1298_v40 }
 0x684   :  { %v1318_v41 = vpop.f32.mrf.mxu3 }
 0x685   :  { %v1319_v42 = vadd.f32 %v1815_v49, %v1318_v41 }
 0x687   :  { %1331 = vrot.lane.b32.xlu0 %v1319_v42, %s1608_s23  ;;  %1322 = vrot.lane.b32.xlu1 %v1319_v42, %s1614_s16 }
 0x6f9   :  { %v1323_v43 = vpop.permute.xlu1 %1322  ;;  %v1332_v59 = vpop.permute.xlu0 %1331 }
 0x6fa   :  { %v1325_v44 = vadd.f32 %v1323_v43, %v1823_v55  ;;  %v1334_v61 = vadd.f32 %v1332_v59, %v1826_v63 }
 0x6fc   :  { %v1326_v45 = vsub.f32 0.0, %v1325_v44  ;;  %v1335_v62 = vsub.f32 0.0, %v1334_v61 }
 0x6fe   :  { %v1327_v46 = vmul.f32 1.442695, %v1326_v45  ;;  %v1336_v0 = vmul.f32 1.442695, %v1335_v62 }
 0x700   :  { %1482 = vpow2.f32 %v1327_v46 }
 0x706   :  { %v1483_v50 = vpop.eup %1482 }
 0x707   :  { %v1329_v51 = vadd.f32 1.0, %v1483_v50 }
 0x709   :  { %1484 = vrcp.f32 %v1329_v51 }
 0x70f   :  { %v1485_v52 = vpop.eup %1484 }
 0x710   :  { %v1340_v53 = vmul.f32 %v1485_v52, %v1319_v42 }
 0x712   :  { %v1341_v54 = vadd.f32 %v1340_v53, %v1829_v7 }
 0x714   :  { %1486 = vtanh.f32 %v1341_v54 }
 0x715   :  { %1488 = vpow2.f32 %v1336_v0 }
 0x71a   :  { %v1487_v56 = vpop.eup %1486 }
 0x71b   :  { %1344 = vrot.lane.b32.xlu2 %v1487_v56, %s1613_s15  ;;  %v1489_v3 = vpop.eup %1488 }
 0x71c   :  { %v1338_v4 = vadd.f32 1.0, %v1489_v3 }
 0x71e   :  { %1490 = vrcp.f32 %v1338_v4 }
 0x724   :  { %v1491_v38 = vpop.eup %1490 }
 0x775   :  { %v1345_v57 = vpop.permute.xlu2 %1344 }
 0x776   :  { %v1347_v58 = vsub.f32 %v1295_v37, %v1345_v57 }
 0x778   :  { %1349 = vrot.lane.b32.xlu1 %v1347_v58, %s1608_s23 }
 0x7ea   :  { %v1350_v39 = vpop.permute.xlu1 %1349 }
 0x7eb   :  { %v1352_v5 = vmul.f32 %v1491_v38, %v1350_v39 }
 0x7ed   :  { %v1353_v6 = vadd.f32 %v1487_v56, %v1352_v5 }
 0x7ef   :  { %1355 = vrot.lane.b32.xlu2 %v1353_v6, %s1614_s16 }
 0x849   :  { %v1356_v9 = vpop.permute.xlu2 %1355 }
 0x84a   :  { %1447 = vmatmul.msk.f32.vlgmr.msra.gmra.mxu1 %vm1191_vm0, %v1356_v9 }
 0x8c7   :  { %v1376_v10 = vpop.f32.mrf.mxu1 }
 0x8c8   :  { %v1377_v17 = vadd.f32 %v1815_v49, %v1376_v10 }
 0x8ca   :  { %1398 = vrot.lane.b32.xlu1 %v1377_v17, %s1608_s23  ;;  %1380 = vrot.lane.b32.xlu0 %v1377_v17, %s1613_s15 }
 0x8d2   :  { %1389 = vrot.lane.b32.xlu0 %v1377_v17, %s1614_s16 }
 0x93c   :  { %v1381_v18 = vpop.permute.xlu0 %1380  ;;  %v1399_v1 = vpop.permute.xlu1 %1398 }
 0x93d   :  { %v1383_v11 = vadd.f32 %v1381_v18, %v1823_v55 }
 0x93f   :  { %v1384_v47 = vsub.f32 0.0, %v1383_v11 }
 0x941   :  { %v1385_v48 = vmul.f32 1.442695, %v1384_v47 }
 0x943   :  { %1492 = vpow2.f32 %v1385_v48 }
 0x944   :  { %v1390_v55 = vpop.permute.xlu0 %1389 }
 0x945   :  { %v1392_v14 = vadd.f32 %v1390_v55, %v1826_v63 }
 0x947   :  { %v1393_v15 = vsub.f32 0.0, %v1392_v14 }
 0x949   :  { %v1493_v27 = vpop.eup %1492  ;;  %v1394_v16 = vmul.f32 1.442695, %v1393_v15 }
 0x94a   :  { %v1387_v28 = vadd.f32 1.0, %v1493_v27 }
 0x94c   :  { %1494 = vrcp.f32 %v1387_v28 }
 0x952   :  { %v1495_v60 = vpop.eup %1494 }
 0x953   :  { %v1401_v2 = vmul.f32 %v1495_v60, %v1399_v1 }
 0x955   :  { %v1402_v49 = vadd.f32 %v1401_v2, %v1829_v7 }
 0x957   :  { %1496 = vtanh.f32 %v1402_v49 }
 0x958   :  { %1498 = vpow2.f32 %v1394_v16 }
 0x95d   :  { %v1497_v8 = vpop.eup %1496 }
 0x95e   :  { %1405 = vrot.lane.b32.xlu2 %v1497_v8, %s1613_s15  ;;  %v1499_v19 = vpop.eup %1498 }
 0x95f   :  { %v1396_v20 = vadd.f32 1.0, %v1499_v19 }
 0x961   :  { %1500 = vrcp.f32 %v1396_v20 }
 0x967   :  { %v1501_v21 = vpop.eup %1500 }
 0x9b8   :  { %v1406_v12 = vpop.permute.xlu2 %1405 }
 0x9b9   :  { %v1408_v13 = vsub.f32 %v1353_v6, %v1406_v12 }
 0x9bb   :  { %1410 = vrot.lane.b32.xlu1 %v1408_v13, %s1608_s23 }
 0xa2d   :  { %v1411_v22 = vpop.permute.xlu1 %1410 }
 0xa2e   :  { %v1413_v7 = vmul.f32 %v1501_v21, %v1411_v22 }
 0xa30   :  { %v1414_v23 = vadd.f32 %v1497_v8, %v1413_v7 }
 0xa32   :  { %1416 = vrot.lane.b32.xlu2 %v1414_v23, %s1608_s23 }
 0xa8c   :  { %v1417_v24 = vpop.permute.xlu2 %1416 }
 0xa8d   :  { %1419 = vst.msk [vmem:[%s1878_s11] sm:$0xff] %vm1191_vm0, %v1417_v24 }
 0xa8e   :  { %1424 = vsyncpa [#allocation7], 1 }
 0xa8f   :  { %1425 = vsyncmov [#allocation5] }
 0xa92   :  { %s1426_s19 = vpop.sfrf %1425 }
 0xa93   :  { %p1448_p0 = scmp.ne.s32.totalorder %s1426_s19, 0 }
 0xa95   :  { %1430 = shalt.err (%p1448_p0)  }
 0xa96   :  { %1432 = vsyncmov [#allocation5 + $0x1] }
 0xa99   :  { %s1433_s20 = vpop.sfrf %1432 }
 0xa9a   :  { %p1449_p1 = scmp.ne.s32.totalorder %s1433_s20, 0 }
 0xa9c   :  { %1437 = shalt.err (%p1449_p1)  }
 0xa9d   :  { %1439 = vsyncmov [#allocation5 + $0x2] }
 0xaa0   :  { %s1440_s21 = vpop.sfrf %1439 }
 0xaa1   :  { %p1450_p2 = scmp.ne.s32.totalorder %s1440_s21, 0 }
 0xaa3   :  { %1444 = shalt.err (%p1450_p2)  }

</bundles_post_ra>
